<compile_context>
chip_gen: v6e
topology: v6e:2x2x1
jax: 0.10.0
libtpu: 0.0.40
codegen_flags: <defaults>
</compile_context>

<pallas_src>
import jax
import jax.numpy as jnp
from jax.experimental import pallas as pl
from jax.experimental.pallas import tpu as pltpu


# -----------------------------------------------------------------------------
# Fused kernel: single grid step, batch unrolled statically inside.
# Layout: channels on sublanes, H*W on lanes.
# -----------------------------------------------------------------------------
def _conv_dense2_kernel(cols_ref, cwT_ref, w1T_ref, w2T_ref, pwT_ref,
                        b1_ref, vec_ref, o_ref):
    # Packed per-channel column vectors, sliced statically: (Cout, 1) each.
    cb    = vec_ref[:, 0:1]   # conv bias
    bn_s  = vec_ref[:, 1:2]   # folded BN scale
    bn_t  = vec_ref[:, 2:3]   # folded BN shift
    pb    = vec_ref[:, 3:4]   # point-conv bias
    se_b2 = vec_ref[:, 4:5]   # SE second FC bias

    cwT = cwT_ref[...]        # (Cout, K_pad)   bf16
    w1T = w1T_ref[...]        # (red, Cout)     bf16
    w2T = w2T_ref[...]        # (Cout, red)     bf16
    pwT = pwT_ref[...]        # (Cout, Cout)    bf16
    b1  = b1_ref[...]         # (red, 1)        f32

    B = cols_ref.shape[0]
    for b in range(B):  # B is tiny and static -> unrolled, single grid step
        # --- 3x3 'same' conv as one fully aligned MXU matmul ----------------
        a = jnp.dot(cwT, cols_ref[b],
                    preferred_element_type=jnp.float32) + cb      # (Cout, HW) f32

        # --- SEBlock: global avg pool -> FC -> ReLU -> FC -> sigmoid --------
        y = jnp.mean(a, axis=1, keepdims=True)                    # (Cout, 1)
        y = jnp.dot(w1T, y.astype(jnp.bfloat16),
                    preferred_element_type=jnp.float32) + b1      # (red, 1)
        y = jnp.maximum(y, 0.0)
        y = jnp.dot(w2T, y.astype(jnp.bfloat16),
                    preferred_element_type=jnp.float32) + se_b2   # (Cout, 1)
        a = a * jax.nn.sigmoid(y)                                 # gate over lanes

        # --- BatchNorm2d (eval) folded into per-channel affine --------------
        a = a * bn_s + bn_t

        # --- depthwise_activate: 1x1 point conv, then elementwise max -------
        # TODO(synk): depth_conv omitted - its output is discarded upstream.
        z = jnp.dot(pwT, a.astype(jnp.bfloat16),
                    preferred_element_type=jnp.float32) + pb      # (Cout, HW)
        o_ref[b] = jnp.maximum(a, z)                              # lane-dense store


# -----------------------------------------------------------------------------
# Wrapper helpers
# -----------------------------------------------------------------------------
def _im2col_3x3_nchw(x_nchw, k_pad):
    """(B, Cin, H, W) -> (B, K_pad, H*W) patches for a 3x3 'same' conv.

    Tap order is (ky, kx, cin) on the K axis, matching cw.reshape(9*Cin, Cout)
    of an HWIO weight.  Built channels-first (no NHWC transpose) and padded on
    K so the kernel's matmul is fully (sublane, lane)-aligned.
    """
    B, C, H, W = x_nchw.shape
    xp = jnp.pad(x_nchw, ((0, 0), (0, 0), (1, 1), (1, 1)))
    taps = [xp[:, :, ky:ky + H, kx:kx + W] for ky in range(3) for kx in range(3)]
    cols = jnp.concatenate(taps, axis=1).reshape(B, 9 * C, H * W)
    if k_pad > 9 * C:
        cols = jnp.pad(cols, ((0, 0), (0, k_pad - 9 * C), (0, 0)))
    return cols


def _full_block(arr):
    """BlockSpec mapping the whole (grid-invariant) array into VMEM."""
    nd = arr.ndim
    return pl.BlockSpec(arr.shape, lambda i: (0,) * nd)


def conv_dense2_forward(params, x_nchw, x_last=None, r_img=None):
    """Pallas forward of conv_dense2.

    `x_last` / `r_img` mirror the PyTorch signature but are unused by the
    reference forward (it only consumes x).
    """
    del x_last, r_img

    B, Cin, H, W = x_nchw.shape
    HW = H * W
    Cout = params["pw_t"].shape[0]
    red = params["se_w1_t"].shape[0]
    K_pad = params["cw_t"].shape[1]

    # Pre-cast to bf16 (MXU-native, halves im2col bytes), then channels-first
    # im2col -- a single fused pad/slice/concat in XLA, no layout transposes.
    cols = _im2col_3x3_nchw(x_nchw.astype(jnp.bfloat16), K_pad)    # (B, K_pad, HW)

    weights = (params["cw_t"], params["se_w1_t"], params["se_w2_t"],
               params["pw_t"], params["se_b1_col"], params["vec"])

    flops = 2 * B * HW * Cout * (K_pad + Cout) + 4 * B * Cout * red
    bytes_accessed = (cols.size * 2
                      + (K_pad + 2 * red + Cout) * Cout * 2
                      + (red + 5 * Cout) * 4
                      + B * Cout * HW * 4)

    out = pl.pallas_call(
        _conv_dense2_kernel,
        out_shape=jax.ShapeDtypeStruct((B, Cout, HW), jnp.float32),
        grid=(1,),                                 # batch folded into one step
        in_specs=[_full_block(cols)] + [_full_block(w) for w in weights],
        out_specs=pl.BlockSpec((B, Cout, HW), lambda i: (0, 0, 0)),
        compiler_params=pltpu.CompilerParams(
            dimension_semantics=("arbitrary",),
            # tiny footprint (<1 MiB), but be explicit (v5e default: 16 MiB)
            vmem_limit_bytes=32 * 1024 * 1024,
        ),
        cost_estimate=pl.CostEstimate(
            flops=flops, transcendentals=B * Cout,
            bytes_accessed=bytes_accessed),
    )(cols, *weights)

    # Output is already NCHW-flat: a free reshape, no transpose.
    return out.reshape(B, Cout, H, W)


# -----------------------------------------------------------------------------
# Deterministic parameters (shapes follow the PyTorch __init__), pre-laid-out
# for the channels-first kernel: transposed, K-padded, bf16 matmul operands.
# -----------------------------------------------------------------------------
def init_params(key, input_dim, output_dim):
    ks = jax.random.split(key, 12)

    def nrm(k, shape, s=0.05):
        return (s * jax.random.normal(k, shape)).astype(jnp.float32)

    red = output_dim * 6            # SEBlock(output_dim, reduction=output_dim*6)
    K = 9 * input_dim
    K_pad = ((K + 127) // 128) * 128

    cw_hwio = nrm(ks[0], (3, 3, input_dim, output_dim))             # HWIO
    cw_t = jnp.pad(cw_hwio.reshape(K, output_dim).T,                # (Cout, K_pad)
                   ((0, 0), (0, K_pad - K)))
    cb = nrm(ks[1], (output_dim,))
    se_w1_t = nrm(ks[2], (red, output_dim))          # Linear(Cout, red).weight
    se_b1 = nrm(ks[3], (red,))
    se_w2_t = nrm(ks[4], (output_dim, red))          # Linear(red, Cout).weight
    se_b2 = nrm(ks[5], (output_dim,))
    bn_g = 1.0 + nrm(ks[6], (output_dim,))
    bn_b = nrm(ks[7], (output_dim,))
    bn_m = nrm(ks[8], (output_dim,))
    bn_v = 1.0 + jnp.abs(nrm(ks[9], (output_dim,)))
    pw_t = nrm(ks[10], (output_dim, output_dim))     # point_conv weight (O, I)
    pb = nrm(ks[11], (output_dim,))

    # Fold BatchNorm (eval mode) into a per-channel scale / shift.
    bn_scale = bn_g * jax.lax.rsqrt(bn_v + 1e-5)
    bn_shift = bn_b - bn_m * bn_scale

    # Pack the five per-channel f32 vectors into one (Cout, 5) kernel input.
    vec = jnp.stack([cb, bn_scale, bn_shift, pb, se_b2], axis=1)

    return dict(
        # kernel-format (transposed / padded / bf16) operands
        cw_t=cw_t.astype(jnp.bfloat16),
        se_w1_t=se_w1_t.astype(jnp.bfloat16),
        se_w2_t=se_w2_t.astype(jnp.bfloat16),
        pw_t=pw_t.astype(jnp.bfloat16),
        se_b1_col=se_b1.reshape(red, 1),
        vec=vec,
        # raw f32 parameters kept for the reference implementation
        cb=cb, se_b1=se_b1, se_b2=se_b2, pb=pb,
        bn_g=bn_g, bn_b=bn_b, bn_m=bn_m, bn_v=bn_v,
    )


# -----------------------------------------------------------------------------
# Pure-JAX (XLA) reference in f32 for correctness checking
# -----------------------------------------------------------------------------
def conv_dense2_ref(params, x_nchw):
    hp = jax.lax.Precision.HIGHEST
    x = jnp.transpose(x_nchw, (0, 2, 3, 1)).astype(jnp.float32)     # NCHW -> NHWC
    Cin = x.shape[-1]
    Cout = params["pw_t"].shape[0]
    K = 9 * Cin
    w_hwio = params["cw_t"].astype(jnp.float32)[:, :K].T.reshape(3, 3, Cin, Cout)
    a = jax.lax.conv_general_dilated(
        x, w_hwio, window_strides=(1, 1), padding="SAME",
        dimension_numbers=("NHWC", "HWIO", "NHWC"), precision=hp) + params["cb"]
    y = jnp.mean(a, axis=(1, 2))                                    # (B, Cout)
    w1 = params["se_w1_t"].astype(jnp.float32)                      # (red, Cout)
    w2 = params["se_w2_t"].astype(jnp.float32)                      # (Cout, red)
    y = jnp.maximum(jnp.dot(y, w1.T, precision=hp) + params["se_b1"], 0.0)
    s = jax.nn.sigmoid(jnp.dot(y, w2.T, precision=hp) + params["se_b2"])
    a = a * s[:, None, None, :]
    scale = params["bn_g"] * jax.lax.rsqrt(params["bn_v"] + 1e-5)
    shift = params["bn_b"] - params["bn_m"] * scale
    a = a * scale + shift
    pw = params["pw_t"].astype(jnp.float32)                         # (Cout, Cout)
    z = jnp.einsum("bhwc,dc->bhwd", a, pw, precision=hp) + params["pb"]
    out = jnp.maximum(a, z)
    return jnp.transpose(out, (0, 3, 1, 2))                         # NHWC -> NCHW


# -----------------------------------------------------------------------------
if __name__ == "__main__":
    INPUT_DIM, OUTPUT_DIM = 9, 48
    B, H, W = 2, 16, 16

    root = jax.random.PRNGKey(0)
    k_x, k_xl, k_r, k_p = jax.random.split(root, 4)
    x = jax.random.normal(k_x, (B, INPUT_DIM, H, W), dtype=jnp.float32)
    # Unused by the forward; they mirror conv_dense2.forward(x, x_last, r_img).
    x_last = jax.random.normal(k_xl, (B, OUTPUT_DIM, H, W), dtype=jnp.float32)
    r_img = jax.random.normal(k_r, (B, 3, H, W), dtype=jnp.float32)
    params = init_params(k_p, INPUT_DIM, OUTPUT_DIM)

    out = jax.jit(conv_dense2_forward)(params, x, x_last, r_img)
    out = jax.block_until_ready(out)

    assert out.shape == (B, OUTPUT_DIM, H, W), out.shape
    assert out.dtype == jnp.float32
    assert bool(jnp.all(jnp.isfinite(out)))

    ref = conv_dense2_ref(params, x)
    max_err = float(jnp.max(jnp.abs(out - ref)))
    assert max_err < 1e-1, f"max |kernel - reference| = {max_err}"

    print("KERNEL_OK")
</pallas_src>

<mosaic_0001>
module attributes {stable_mosaic.version = 11 : i64} {
  func.func @_conv_dense2_kernel(%arg0: i32, %arg1: memref<2x128x256xbf16, #tpu.memory_space<vmem>>, %arg2: memref<48x128xbf16, #tpu.memory_space<vmem>>, %arg3: memref<288x48xbf16, #tpu.memory_space<vmem>>, %arg4: memref<48x288xbf16, #tpu.memory_space<vmem>>, %arg5: memref<48x48xbf16, #tpu.memory_space<vmem>>, %arg6: memref<288x1xf32, #tpu.memory_space<vmem>>, %arg7: memref<48x5xf32, #tpu.memory_space<vmem>>, %arg8: memref<2x48x256xf32, #tpu.memory_space<vmem>>) attributes {dimension_semantics = [#tpu.dimension_semantics<arbitrary>], iteration_bounds = array<i64: 1>, scalar_prefetch = 0 : i64, scratch_operands = 0 : i64, tpu.core_type = #tpu.core_type<tc>, window_params = [{pipeline_mode = #tpu.pipeline_mode<synchronous>, transform_indices = @transform_0, window_bounds = array<i64: 2, 128, 256>}, {pipeline_mode = #tpu.pipeline_mode<synchronous>, transform_indices = @transform_1, window_bounds = array<i64: 48, 128>}, {pipeline_mode = #tpu.pipeline_mode<synchronous>, transform_indices = @transform_2, window_bounds = array<i64: 288, 48>}, {pipeline_mode = #tpu.pipeline_mode<synchronous>, transform_indices = @transform_3, window_bounds = array<i64: 48, 288>}, {pipeline_mode = #tpu.pipeline_mode<synchronous>, transform_indices = @transform_4, window_bounds = array<i64: 48, 48>}, {pipeline_mode = #tpu.pipeline_mode<synchronous>, transform_indices = @transform_5, window_bounds = array<i64: 288, 1>}, {pipeline_mode = #tpu.pipeline_mode<synchronous>, transform_indices = @transform_6, window_bounds = array<i64: 48, 5>}, {pipeline_mode = #tpu.pipeline_mode<synchronous>, transform_indices = @transform_7, window_bounds = array<i64: 2, 48, 256>}]} {
    %c0 = arith.constant 0 : index
    %c0_0 = arith.constant 0 : index
    %0 = vector.load %arg7[%c0, %c0_0] : memref<48x5xf32, #tpu.memory_space<vmem>>, vector<48x1xf32>
    %c0_1 = arith.constant 0 : index
    %c1 = arith.constant 1 : index
    %1 = vector.load %arg7[%c0_1, %c1] : memref<48x5xf32, #tpu.memory_space<vmem>>, vector<48x1xf32>
    %c0_2 = arith.constant 0 : index
    %c2 = arith.constant 2 : index
    %2 = vector.load %arg7[%c0_2, %c2] : memref<48x5xf32, #tpu.memory_space<vmem>>, vector<48x1xf32>
    %c0_3 = arith.constant 0 : index
    %c3 = arith.constant 3 : index
    %3 = vector.load %arg7[%c0_3, %c3] : memref<48x5xf32, #tpu.memory_space<vmem>>, vector<48x1xf32>
    %c0_4 = arith.constant 0 : index
    %c4 = arith.constant 4 : index
    %4 = vector.load %arg7[%c0_4, %c4] : memref<48x5xf32, #tpu.memory_space<vmem>>, vector<48x1xf32>
    %c0_5 = arith.constant 0 : index
    %c0_6 = arith.constant 0 : index
    %5 = vector.load %arg2[%c0_5, %c0_6] : memref<48x128xbf16, #tpu.memory_space<vmem>>, vector<48x128xbf16>
    %c0_7 = arith.constant 0 : index
    %c0_8 = arith.constant 0 : index
    %6 = vector.load %arg3[%c0_7, %c0_8] : memref<288x48xbf16, #tpu.memory_space<vmem>>, vector<288x48xbf16>
    %c0_9 = arith.constant 0 : index
    %c0_10 = arith.constant 0 : index
    %7 = vector.load %arg4[%c0_9, %c0_10] : memref<48x288xbf16, #tpu.memory_space<vmem>>, vector<48x288xbf16>
    %c0_11 = arith.constant 0 : index
    %c0_12 = arith.constant 0 : index
    %8 = vector.load %arg5[%c0_11, %c0_12] : memref<48x48xbf16, #tpu.memory_space<vmem>>, vector<48x48xbf16>
    %c0_13 = arith.constant 0 : index
    %c0_14 = arith.constant 0 : index
    %9 = vector.load %arg6[%c0_13, %c0_14] : memref<288x1xf32, #tpu.memory_space<vmem>>, vector<288x1xf32>
    %c0_15 = arith.constant 0 : index
    %c0_16 = arith.constant 0 : index
    %c0_17 = arith.constant 0 : index
    %10 = vector.load %arg1[%c0_15, %c0_16, %c0_17] : memref<2x128x256xbf16, #tpu.memory_space<vmem>>, vector<1x128x256xbf16>
    %11 = vector.shape_cast %10 : vector<1x128x256xbf16> to vector<128x256xbf16>
    %cst = arith.constant dense<0.000000e+00> : vector<48x256xf32>
    %12 = tpu.matmul %5, %11, %cst {dimension_numbers = #tpu.dot_dimension_numbers<[1], [0], [0], [1], [0, 0, 1, 1], [], []>} : vector<48x128xbf16>, vector<128x256xbf16>, vector<48x256xf32> -> vector<48x256xf32>
    %13 = vector.broadcast %0 : vector<48x1xf32> to vector<48x256xf32>
    %14 = arith.addf %12, %13 : vector<48x256xf32>
    %cst_18 = arith.constant dense<0.000000e+00> : vector<48xf32>
    %15 = vector.multi_reduction <add>, %14, %cst_18 [1] : vector<48x256xf32> to vector<48xf32>
    %16 = vector.shape_cast %15 : vector<48xf32> to vector<48x1xf32>
    %cst_19 = arith.constant 2.560000e+02 : f32
    %17 = vector.broadcast %cst_19 : f32 to vector<48x1xf32>
    %18 = arith.divf %16, %17 : vector<48x1xf32>
    %19 = arith.truncf %18 : vector<48x1xf32> to vector<48x1xbf16>
    %cst_20 = arith.constant dense<0.000000e+00> : vector<288x1xf32>
    %20 = tpu.matmul %6, %19, %cst_20 {dimension_numbers = #tpu.dot_dimension_numbers<[1], [0], [0], [1], [0, 0, 1, 1], [], []>} : vector<288x48xbf16>, vector<48x1xbf16>, vector<288x1xf32> -> vector<288x1xf32>
    %21 = arith.addf %20, %9 : vector<288x1xf32>
    %cst_21 = arith.constant 0.000000e+00 : f32
    %22 = vector.broadcast %cst_21 : f32 to vector<288x1xf32>
    %23 = arith.maximumf %21, %22 : vector<288x1xf32>
    %24 = arith.truncf %23 : vector<288x1xf32> to vector<288x1xbf16>
    %cst_22 = arith.constant dense<0.000000e+00> : vector<48x1xf32>
    %25 = tpu.matmul %7, %24, %cst_22 {dimension_numbers = #tpu.dot_dimension_numbers<[1], [0], [0], [1], [0, 0, 1, 1], [], []>} : vector<48x288xbf16>, vector<288x1xbf16>, vector<48x1xf32> -> vector<48x1xf32>
    %26 = arith.addf %25, %4 : vector<48x1xf32>
    %27 = arith.negf %26 : vector<48x1xf32>
    %28 = math.exp %27 : vector<48x1xf32>
    %cst_23 = arith.constant 1.000000e+00 : f32
    %29 = vector.broadcast %cst_23 : f32 to vector<48x1xf32>
    %30 = arith.addf %29, %28 : vector<48x1xf32>
    %31 = arith.divf %29, %30 : vector<48x1xf32>
    %32 = vector.broadcast %31 : vector<48x1xf32> to vector<48x256xf32>
    %33 = arith.mulf %14, %32 : vector<48x256xf32>
    %34 = vector.broadcast %1 : vector<48x1xf32> to vector<48x256xf32>
    %35 = arith.mulf %33, %34 : vector<48x256xf32>
    %36 = vector.broadcast %2 : vector<48x1xf32> to vector<48x256xf32>
    %37 = arith.addf %35, %36 : vector<48x256xf32>
    %38 = arith.truncf %37 : vector<48x256xf32> to vector<48x256xbf16>
    %cst_24 = arith.constant dense<0.000000e+00> : vector<48x256xf32>
    %39 = tpu.matmul %8, %38, %cst_24 {dimension_numbers = #tpu.dot_dimension_numbers<[1], [0], [0], [1], [0, 0, 1, 1], [], []>} : vector<48x48xbf16>, vector<48x256xbf16>, vector<48x256xf32> -> vector<48x256xf32>
    %40 = vector.broadcast %3 : vector<48x1xf32> to vector<48x256xf32>
    %41 = arith.addf %39, %40 : vector<48x256xf32>
    %42 = arith.maximumf %37, %41 : vector<48x256xf32>
    %c0_25 = arith.constant 0 : index
    %c0_26 = arith.constant 0 : index
    %c0_27 = arith.constant 0 : index
    %43 = vector.load %arg8[%c0_25, %c0_26, %c0_27] : memref<2x48x256xf32, #tpu.memory_space<vmem>>, vector<1x48x256xf32>
    %44 = vector.shape_cast %43 : vector<1x48x256xf32> to vector<48x256xf32>
    %45 = vector.shape_cast %42 : vector<48x256xf32> to vector<1x48x256xf32>
    tpu.vector_store %arg8[%c0_25, %c0_26, %c0_27], %45 {strides = array<i32>} : memref<2x48x256xf32, #tpu.memory_space<vmem>>, vector<1x48x256xf32>,
    %c1_28 = arith.constant 1 : index
    %c0_29 = arith.constant 0 : index
    %c0_30 = arith.constant 0 : index
    %46 = vector.load %arg1[%c1_28, %c0_29, %c0_30] : memref<2x128x256xbf16, #tpu.memory_space<vmem>>, vector<1x128x256xbf16>
    %47 = vector.shape_cast %46 : vector<1x128x256xbf16> to vector<128x256xbf16>
    %cst_31 = arith.constant dense<0.000000e+00> : vector<48x256xf32>
    %48 = tpu.matmul %5, %47, %cst_31 {dimension_numbers = #tpu.dot_dimension_numbers<[1], [0], [0], [1], [0, 0, 1, 1], [], []>} : vector<48x128xbf16>, vector<128x256xbf16>, vector<48x256xf32> -> vector<48x256xf32>
    %49 = vector.broadcast %0 : vector<48x1xf32> to vector<48x256xf32>
    %50 = arith.addf %48, %49 : vector<48x256xf32>
    %cst_32 = arith.constant dense<0.000000e+00> : vector<48xf32>
    %51 = vector.multi_reduction <add>, %50, %cst_32 [1] : vector<48x256xf32> to vector<48xf32>
    %52 = vector.shape_cast %51 : vector<48xf32> to vector<48x1xf32>
    %cst_33 = arith.constant 2.560000e+02 : f32
    %53 = vector.broadcast %cst_33 : f32 to vector<48x1xf32>
    %54 = arith.divf %52, %53 : vector<48x1xf32>
    %55 = arith.truncf %54 : vector<48x1xf32> to vector<48x1xbf16>
    %cst_34 = arith.constant dense<0.000000e+00> : vector<288x1xf32>
    %56 = tpu.matmul %6, %55, %cst_34 {dimension_numbers = #tpu.dot_dimension_numbers<[1], [0], [0], [1], [0, 0, 1, 1], [], []>} : vector<288x48xbf16>, vector<48x1xbf16>, vector<288x1xf32> -> vector<288x1xf32>
    %57 = arith.addf %56, %9 : vector<288x1xf32>
    %cst_35 = arith.constant 0.000000e+00 : f32
    %58 = vector.broadcast %cst_35 : f32 to vector<288x1xf32>
    %59 = arith.maximumf %57, %58 : vector<288x1xf32>
    %60 = arith.truncf %59 : vector<288x1xf32> to vector<288x1xbf16>
    %cst_36 = arith.constant dense<0.000000e+00> : vector<48x1xf32>
    %61 = tpu.matmul %7, %60, %cst_36 {dimension_numbers = #tpu.dot_dimension_numbers<[1], [0], [0], [1], [0, 0, 1, 1], [], []>} : vector<48x288xbf16>, vector<288x1xbf16>, vector<48x1xf32> -> vector<48x1xf32>
    %62 = arith.addf %61, %4 : vector<48x1xf32>
    %63 = arith.negf %62 : vector<48x1xf32>
    %64 = math.exp %63 : vector<48x1xf32>
    %cst_37 = arith.constant 1.000000e+00 : f32
    %65 = vector.broadcast %cst_37 : f32 to vector<48x1xf32>
    %66 = arith.addf %65, %64 : vector<48x1xf32>
    %67 = arith.divf %65, %66 : vector<48x1xf32>
    %68 = vector.broadcast %67 : vector<48x1xf32> to vector<48x256xf32>
    %69 = arith.mulf %50, %68 : vector<48x256xf32>
    %70 = vector.broadcast %1 : vector<48x1xf32> to vector<48x256xf32>
    %71 = arith.mulf %69, %70 : vector<48x256xf32>
    %72 = vector.broadcast %2 : vector<48x1xf32> to vector<48x256xf32>
    %73 = arith.addf %71, %72 : vector<48x256xf32>
    %74 = arith.truncf %73 : vector<48x256xf32> to vector<48x256xbf16>
    %cst_38 = arith.constant dense<0.000000e+00> : vector<48x256xf32>
    %75 = tpu.matmul %8, %74, %cst_38 {dimension_numbers = #tpu.dot_dimension_numbers<[1], [0], [0], [1], [0, 0, 1, 1], [], []>} : vector<48x48xbf16>, vector<48x256xbf16>, vector<48x256xf32> -> vector<48x256xf32>
    %76 = vector.broadcast %3 : vector<48x1xf32> to vector<48x256xf32>
    %77 = arith.addf %75, %76 : vector<48x256xf32>
    %78 = arith.maximumf %73, %77 : vector<48x256xf32>
    %c1_39 = arith.constant 1 : index
    %c0_40 = arith.constant 0 : index
    %c0_41 = arith.constant 0 : index
    %79 = vector.load %arg8[%c1_39, %c0_40, %c0_41] : memref<2x48x256xf32, #tpu.memory_space<vmem>>, vector<1x48x256xf32>
    %80 = vector.shape_cast %79 : vector<1x48x256xf32> to vector<48x256xf32>
    %81 = vector.shape_cast %78 : vector<48x256xf32> to vector<1x48x256xf32>
    tpu.vector_store %arg8[%c1_39, %c0_40, %c0_41], %81 {strides = array<i32>} : memref<2x48x256xf32, #tpu.memory_space<vmem>>, vector<1x48x256xf32>,
    return
  }
  func.func @transform_0(%arg0: i32) -> (i32, i32, i32) {
    %c0_i32 = arith.constant 0 : i32
    %c0_i32_0 = arith.constant 0 : i32
    %c0_i32_1 = arith.constant 0 : i32
    %c0_i32_2 = arith.constant 0 : i32
    return %c0_i32, %c0_i32_0, %c0_i32_1 : i32, i32, i32
  }
  func.func @transform_1(%arg0: i32) -> (i32, i32) {
    %c0_i32 = arith.constant 0 : i32
    %c0_i32_0 = arith.constant 0 : i32
    %c0_i32_1 = arith.constant 0 : i32
    return %c0_i32, %c0_i32_0 : i32, i32
  }
  func.func @transform_2(%arg0: i32) -> (i32, i32) {
    %c0_i32 = arith.constant 0 : i32
    %c0_i32_0 = arith.constant 0 : i32
    %c0_i32_1 = arith.constant 0 : i32
    return %c0_i32, %c0_i32_0 : i32, i32
  }
  func.func @transform_3(%arg0: i32) -> (i32, i32) {
    %c0_i32 = arith.constant 0 : i32
    %c0_i32_0 = arith.constant 0 : i32
    %c0_i32_1 = arith.constant 0 : i32
    return %c0_i32, %c0_i32_0 : i32, i32
  }
  func.func @transform_4(%arg0: i32) -> (i32, i32) {
    %c0_i32 = arith.constant 0 : i32
    %c0_i32_0 = arith.constant 0 : i32
    %c0_i32_1 = arith.constant 0 : i32
    return %c0_i32, %c0_i32_0 : i32, i32
  }
  func.func @transform_5(%arg0: i32) -> (i32, i32) {
    %c0_i32 = arith.constant 0 : i32
    %c0_i32_0 = arith.constant 0 : i32
    %c0_i32_1 = arith.constant 0 : i32
    return %c0_i32, %c0_i32_0 : i32, i32
  }
  func.func @transform_6(%arg0: i32) -> (i32, i32) {
    %c0_i32 = arith.constant 0 : i32
    %c0_i32_0 = arith.constant 0 : i32
    %c0_i32_1 = arith.constant 0 : i32
    return %c0_i32, %c0_i32_0 : i32, i32
  }
  func.func @transform_7(%arg0: i32) -> (i32, i32, i32) {
    %c0_i32 = arith.constant 0 : i32
    %c0_i32_0 = arith.constant 0 : i32
    %c0_i32_1 = arith.constant 0 : i32
    %c0_i32_2 = arith.constant 0 : i32
    return %c0_i32, %c0_i32_0, %c0_i32_1 : i32, i32, i32
  }
}

</mosaic_0001>

<bundles_post_ra>
// kernel: conv_dense2_forward.1
= control target key start
LH: loop header
LB: loop body
LE: loop exit
PB: predicated region body
PF: predicated region fallthrough
CT: control target
= control target key end

     0   :  { %v3828_v1 = vmov 0   ;;  %vm454_vm0 = vcmask 392192   ;;  %s2565_s12 = smov 124   ;;  %vm2567_vm1 = vmmov 0   ;;  %vm803_vm2 = vcmask 261120   ;;  %s3820_s0 = inlined_call_operand.vmem [shape: bf16[2,128,256], index: 0, kind: input, shape index: {}]   ;;  %s3821_s1 = inlined_call_operand.vmem [shape: bf16[48,128], index: 1, kind: input, shape index: {}]   ;;  %s3822_s6 = inlined_call_operand.vmem [shape: f32[48,5], index: 6, kind: input, shape index: {}]   ;;  %s3823_s2 = inlined_call_operand.vmem [shape: bf16[288,48], index: 2, kind: input, shape index: {}]   ;;  %s3824_s3 = inlined_call_operand.vmem [shape: bf16[48,288], index: 3, kind: input, shape index: {}]   ;;  %s3825_s5 = inlined_call_operand.vmem [shape: f32[288,1], index: 5, kind: input, shape index: {}]   ;;  %s3826_s4 = inlined_call_operand.vmem [shape: bf16[48,48], index: 4, kind: input, shape index: {}]   ;;  %s3827_s7 = inlined_call_operand.vmem [shape: f32[2,48,256], index: 7, kind: output, shape index: {}]  }
   0x1   :  { %v2378_v0 = vld [vmem:[%s3820_s0 + $0x74] ss:$8 sps:$4 sm:$0xff]   ;;  %305 = vmatprep.mubr.bf16.mxu0 %v3828_v1  ;;  %2362 = vset.pattern.permute.xlu0 %v3828_v1  ;;  %v2380_v2 = vld [vmem:[%s3820_s0 + $0x70] ss:$8 sps:$4 sm:$0xff]   ;;  %v2381_v3 = vld [vmem:[%s3820_s0 + $0x64] ss:$8 sps:$4 sm:$0xff]  }
   0x2   :  { %2363 = vset.pattern.permute.xlu1 %v3828_v1  ;;  %273 = vmatprep.subr.bf16.mxu0 %v2378_v0  ;;  %v2383_v4 = vld [vmem:[%s3820_s0 + $0x60] ss:$8 sps:$4 sm:$0xff]   ;;  %v2384_v5 = vld [vmem:[%s3820_s0 + $0x54] ss:$8 sps:$4 sm:$0xff]   ;;  %v2386_v6 = vld [vmem:[%s3820_s0 + $0x50] ss:$8 sps:$4 sm:$0xff]  }
   0x3   :  { %274 = vmatpush1.bf16.msra.mxu0 %v2380_v2  ;;  %v2387_v7 = vld [vmem:[%s3820_s0 + $0x44] ss:$8 sps:$4 sm:$0xff]   ;;  %v2389_v8 = vld [vmem:[%s3820_s0 + $0x40] ss:$8 sps:$4 sm:$0xff]   ;;  %v2390_v9 = vld [vmem:[%s3820_s0 + $0x34] ss:$8 sps:$4 sm:$0xff]  }
   0x4   :  { %275 = vmatprep.subr.bf16.mxu0 %v2381_v3  ;;  %v2644_v10 = vld [vmem:[%s3822_s6 + $0x20] sm:$0xff]  ;;  %v2392_v11 = vld [vmem:[%s3820_s0 + $0x30] ss:$8 sps:$4 sm:$0xff]   ;;  %v2661_v14 = vld [vmem:[%s3822_s6 + $0x28] sm:$0xff] }
   0x5   :  { %v2393_v12 = vld [vmem:[%s3820_s0 + $0x24] ss:$8 sps:$4 sm:$0xff]   ;;  %167 = vperm.xlu0 %2362, %v2644_v10   ;;  %v2656_v13 = vld [vmem:[%s3822_s6 + $0x10] sm:$0xff]  ;;  %v2667_v15 = vld [vmem:[%s3822_s6 + $0x18] sm:$0xff] }
   0x6   :  { %157 = vperm.xlu1 %2363, %v2656_v13   ;;  %v2395_v16 = vld [vmem:[%s3820_s0 + $0x20] ss:$8 sps:$4 sm:$0xff]   ;;  %v2396_v18 = vld [vmem:[%s3820_s0 + $0x14] ss:$8 sps:$4 sm:$0xff]   ;;  %v2398_v20 = vld [vmem:[%s3820_s0 + $0x10] ss:$8 sps:$4 sm:$0xff]  }
   0x7   :  { %276 = vmatpush1.bf16.msra.mxu0 %v2383_v4  ;;  %v2675_v17 = vld [vmem:[%s3822_s6] sm:$0xff]  ;;  %v2684_v19 = vld [vmem:[%s3822_s6 + $0x8] sm:$0xff]  ;;  %v2715_v25 = vld [vmem:[%s3821_s1 + $0x10] sm:$0xff]  }
   0x8   :  { %277 = vmatprep.subr.bf16.mxu0 %v2384_v5  ;;  %v2399_v21 = vld [vmem:[%s3820_s0 + $0x4] ss:$8 sps:$4 sm:$0xff]   ;;  %v2401_v22 = vld [vmem:[%s3820_s0] ss:$8 sps:$4 sm:$0xff]  }
   0x9   :  { %172 = vperm.xlu0 %2362, %v2661_v14   ;;  %v2701_v23 = vld [vmem:[%s3821_s1] sm:$0xff]   ;;  %v2708_v24 = vld [vmem:[%s3821_s1 + $0x8] sm:$0xff]  }
   0xa   :  { %162 = vperm.xlu1 %2363, %v2667_v15   ;;  %v2405_v62 = vld [vmem:[%s3823_s2] sm:$0xff]  }
   0xb   :  { %278 = vmatpush1.bf16.msra.mxu0 %v2386_v6  ;;  %2229 = vmatprep.mubr.msk.bf16.mxu1 %vm454_vm0, %v2405_v62 }
   0xc   :  { %279 = vmatprep.subr.bf16.mxu0 %v2387_v7 }
   0xd   :  { %147 = vperm.xlu0 %2362, %v2675_v17  }
   0xe   :  { %152 = vperm.xlu1 %2363, %v2684_v19  }
   0xf   :  { %280 = vmatpush1.bf16.msra.mxu0 %v2389_v8 }
  0x10   :  { %281 = vmatprep.subr.bf16.mxu0 %v2390_v9 }
  0x13   :  { %282 = vmatpush1.bf16.msra.mxu0 %v2392_v11 }
  0x14   :  { %283 = vmatprep.subr.bf16.mxu0 %v2393_v12 }
  0x17   :  { %284 = vmatpush1.bf16.msra.mxu0 %v2395_v16 }
  0x18   :  { %285 = vmatprep.subr.bf16.mxu0 %v2396_v18 }
  0x1b   :  { %286 = vmatpush1.bf16.msra.mxu0 %v2398_v20 }
  0x1c   :  { %287 = vmatprep.subr.bf16.mxu0 %v2399_v21  ;;  %v2406_v21 = vld [vmem:[%s3823_s2 + $0x8] sm:$0xff]  }
  0x1f   :  { %288 = vmatpush1.bf16.msra.mxu0 %v2401_v22  ;;  %v2407_v22 = vld [vmem:[%s3823_s2 + $0x10] sm:$0xff]  }
  0x22   :  { %306 = vmatmul.mubr.bf16.vlgmr.msra.gmra.mxu0 %v2701_v23 }
  0x23   :  { %315 = vmatprep.mubr.bf16.mxu0 %v3828_v1 }
  0x2a   :  { %316 = vmatmul.mubr.bf16.gmra.mxu0 %v2708_v24 }
  0x2b   :  { %325 = vmatprep.mubr.bf16.mxu0 %v3828_v1  ;;  %v120_v1 = vld [vmem:[%s3825_s5 + $0xd8] sm:$0xff] }
  0x32   :  { %326 = vmatmul.mubr.bf16.gmra.mxu0 %v2715_v25 }
  0x80   :  { %v2718_v32 = vpop.permute.xlu0 %167 }
  0x81   :  { %v2720_v35 = vpop.permute.xlu1 %157 }
  0x84   :  { %v2722_v37 = vpop.permute.xlu0 %172 }
  0x85   :  { %v2735_v44 = vpop.permute.xlu1 %162 }
  0x88   :  { %v2746_v49 = vpop.permute.xlu0 %147 }
  0x89   :  { %v2764_v56 = vpop.permute.xlu1 %152 }
  0xe2   :  { %v307_v26 = vpop.f32.mrf.mxu0 }
  0xe3   :  { %v2759_v54 = vadd.f32 %v307_v26, %v2746_v49  ;;  %v2408_v26 = vld [vmem:[%s3823_s2 + $0x18] sm:$0xff]  }
  0xe4   :  { %v309_v27 = vpop.f32.mrf.mxu0 }
  0xe5   :  { %v2749_v50 = vadd.f32 %v309_v27, %v2746_v49  ;;  %3900 = vst [vmem:[#allocation9_spill] sm:$0xff] %v2759_v54  ;;  %v2409_v27 = vld [vmem:[%s3823_s2 + $0x20] sm:$0xff]  }
  0xe6   :  { %v311_v28 = vpop.f32.mrf.mxu0 }
  0xe7   :  { %3898 = vst [vmem:[#allocation7_spill] sm:$0xff] %v2749_v50  ;;  %v336_v59 = vadd.f32 %v2749_v50, %v2759_v54  ;;  %v2774_v60 = vadd.f32 %v311_v28, %v2764_v56  ;;  %v2410_v28 = vld [vmem:[%s3823_s2 + $0x28] sm:$0xff]   ;;  %v105_v54 = vld [vmem:[%s3825_s5 + $0x60] sm:$0xff] }
  0xe8   :  { %v313_v29 = vpop.f32.mrf.mxu0 }
  0xe9   :  { %v2767_v57 = vadd.f32 %v313_v29, %v2764_v56  ;;  %3903 = vst [vmem:[#allocation12_spill] sm:$0xff] %v2774_v60  ;;  %v2411_v29 = vld [vmem:[%s3823_s2 + $0x30] sm:$0xff]  }
  0xea   :  { %v317_v30 = vpop.f32.mrf.mxu0 }
  0xeb   :  { %v2738_v46 = vadd.f32 %v317_v30, %v2720_v35  ;;  %3902 = vst [vmem:[#allocation11_spill] sm:$0xff] %v2767_v57  ;;  %v339_v61 = vadd.f32 %v2767_v57, %v2774_v60  ;;  %v2412_v30 = vld [vmem:[%s3823_s2 + $0x38] sm:$0xff]  }
  0xec   :  { %v319_v31 = vpop.f32.mrf.mxu0 }
  0xed   :  { %v2731_v42 = vadd.f32 %v319_v31, %v2720_v35  ;;  %3895 = vst [vmem:[#allocation4_spill] sm:$0xff] %v2738_v46  ;;  %v2413_v31 = vld [vmem:[%s3823_s2 + $0x40] sm:$0xff]  }
  0xee   :  { %v321_v33 = vpop.f32.mrf.mxu0 }
  0xef   :  { %3894 = vst [vmem:[#allocation3_spill] sm:$0xff] %v2731_v42  ;;  %v342_v53 = vadd.f32 %v2731_v42, %v2738_v46  ;;  %v2762_v55 = vadd.f32 %v321_v33, %v2735_v44  ;;  %v2414_v33 = vld [vmem:[%s3823_s2 + $0x48] sm:$0xff]  }
  0xf0   :  { %v323_v34 = vpop.f32.mrf.mxu0 }
  0xf1   :  { %v2752_v51 = vadd.f32 %v323_v34, %v2735_v44  ;;  %3901 = vst [vmem:[#allocation10_spill] sm:$0xff] %v2762_v55  ;;  %v2415_v34 = vld [vmem:[%s3823_s2 + $0x50] sm:$0xff]  }
  0xf2   :  { %v327_v36 = vpop.f32.mrf.mxu0 }
  0xf3   :  { %v2725_v39 = vadd.f32 %v327_v36, %v2718_v32  ;;  %3899 = vst [vmem:[#allocation8_spill] sm:$0xff] %v2752_v51  ;;  %v345_v58 = vadd.f32 %v2752_v51, %v2762_v55  ;;  %v2416_v36 = vld [vmem:[%s3823_s2 + $0x58] sm:$0xff]  }
  0xf4   :  { %v329_v38 = vpop.f32.mrf.mxu0 }
  0xf5   :  { %v2728_v40 = vadd.f32 %v329_v38, %v2718_v32  ;;  %v2417_v38 = vld [vmem:[%s3823_s2 + $0x60] sm:$0xff]  }
  0xf6   :  { %v331_v41 = vpop.f32.mrf.mxu0 }
  0xf7   :  { %3893 = vst [vmem:[#allocation2_spill] sm:$0xff] %v2728_v40  ;;  %v348_v43 = vadd.f32 %v2728_v40, %v2725_v39  ;;  %v2741_v47 = vadd.f32 %v331_v41, %v2722_v37  ;;  %v2418_v41 = vld [vmem:[%s3823_s2 + $0x68] sm:$0xff]  }
  0xf8   :  { %v333_v45 = vpop.f32.mrf.mxu0 }
  0xf9   :  { %3896 = vst [vmem:[#allocation5_spill] sm:$0xff] %v2741_v47  ;;  %v2744_v48 = vadd.f32 %v333_v45, %v2722_v37  ;;  %349 = vadd.xlane.f32.xlu0 %v348_v43  ;;  %v2419_v43 = vld [vmem:[%s3823_s2 + $0x70] sm:$0xff]   ;;  %v2420_v45 = vld [vmem:[%s3823_s2 + $0x78] sm:$0xff]  }
  0xfb   :  { %3897 = vst [vmem:[#allocation6_spill] sm:$0xff] %v2744_v48  ;;  %v351_v52 = vadd.f32 %v2744_v48, %v2741_v47 }
  0xfd   :  { %352 = vadd.xlane.f32.xlu1 %v351_v52  ;;  %343 = vadd.xlane.f32.xlu0 %v342_v53  ;;  %v2421_v52 = vld [vmem:[%s3823_s2 + $0x80] sm:$0xff]   ;;  %v2422_v53 = vld [vmem:[%s3823_s2 + $0x88] sm:$0xff]  }
 0x101   :  { %346 = vadd.xlane.f32.xlu0 %v345_v58  ;;  %337 = vadd.xlane.f32.xlu1 %v336_v59  ;;  %v2425_v58 = vld [vmem:[%s3824_s3 + $0x34] ss:$12 sps:$4 sm:$0xff]   ;;  %v2856_v59 = vld [vmem:[%s3824_s3 + $0x4] ss:$12 sps:$4 sm:$0xff]  }
 0x102   :  { %845 = vmatprep.mubr.bf16.mxu0 %v2856_v59 }
 0x105   :  { %340 = vadd.xlane.f32.xlu0 %v339_v61  ;;  %v95_v61 = vld [vmem:[%s3825_s5 + $0x10] sm:$0xff] }
 0x112   :  { %793 = vrot.lane.b32.xlu1 %v2644_v10, %s2565_s12 }
 0x116   :  { %789 = vrot.lane.b32.xlu1 %v2656_v13, %s2565_s12 }
 0x11a   :  { %791 = vrot.lane.b32.xlu1 %v2667_v15, %s2565_s12 }
 0x11b   :  { %795 = vrot.lane.b32.xlu0 %v2661_v14, %s2565_s12 }
 0x11e   :  { %787 = vrot.lane.b32.xlu1 %v2684_v19, %s2565_s12 }
 0x11f   :  { %785 = vrot.lane.b32.xlu0 %v2675_v17, %s2565_s12 }
 0x182   :  { %v350_v63 = vpop.xlane.xlu0 %349 }
 0x183   :  { %v359_v3 = vmul.f32 0.00390625, %v350_v63 }
 0x186   :  { %v353_v0 = vpop.xlane.xlu1 %352  ;;  %v344_v2 = vpop.xlane.xlu0 %343 }
 0x187   :  { %v360_v4 = vmul.f32 0.00390625, %v353_v0  ;;  %v357_v7 = vmul.f32 0.00390625, %v344_v2  ;;  %v93_v0 = vld [vmem:[%s3825_s5] sm:$0xff]  ;;  %v96_v2 = vld [vmem:[%s3825_s5 + $0x18] sm:$0xff] }
 0x189   :  { %v363_v5 = vpack.c.bf16 %v360_v4, %v359_v3 }
 0x18a   :  { %v347_v6 = vpop.xlane.xlu0 %346  ;;  %v338_v9 = vpop.xlane.xlu1 %337 }
 0x18b   :  { %v358_v8 = vmul.f32 0.00390625, %v347_v6  ;;  %2223 = vmatprep.subr.bf16.mxu1 %v363_v5  ;;  %v355_v16 = vmul.f32 0.00390625, %v338_v9 }
 0x18c   :  { %2224 = vmatpush3.bf16.msra.mxu1 %v363_v5  ;;  %v94_v5 = vld [vmem:[%s3825_s5 + $0x8] sm:$0xff] }
 0x18d   :  { %v362_v11 = vpack.c.bf16 %v358_v8, %v357_v7 }
 0x18e   :  { %v341_v12 = vpop.xlane.xlu0 %340 }
 0x18f   :  { %v356_v18 = vmul.f32 0.00390625, %v341_v12  ;;  %2225 = vmatprep.subr.bf16.mxu1 %v362_v11 }
 0x190   :  { %2226 = vmatpush3.bf16.msra.mxu1 %v362_v11 }
 0x191   :  { %v361_v20 = vpack.c.bf16 %v356_v18, %v355_v16  ;;  %v99_v16 = vld [vmem:[%s3825_s5 + $0x30] sm:$0xff] }
 0x193   :  { %2227 = vmatprep.subr.bf16.mxu1 %v361_v20 }
 0x194   :  { %2228 = vmatpush3.bf16.msra.mxu1 %v361_v20 }
 0x197   :  { %2230 = vmatmul.mubr.msk.bf16.vlgmr.msra.gmra.mxu1 %vm454_vm0, %v2406_v21 }
 0x198   :  { %2233 = vmatprep.mubr.msk.bf16.mxu1 %vm454_vm0, %v2407_v22 }
 0x19f   :  { %2234 = vmatmul.mubr.msk.bf16.gmra.mxu1 %vm454_vm0, %v2408_v26 }
 0x1a0   :  { %2237 = vmatprep.mubr.msk.bf16.mxu1 %vm454_vm0, %v2409_v27  ;;  %v97_v27 = vld [vmem:[%s3825_s5 + $0x20] sm:$0xff] }
 0x1a7   :  { %2238 = vmatmul.mubr.msk.bf16.gmra.mxu1 %vm454_vm0, %v2410_v28  ;;  %v100_v28 = vld [vmem:[%s3825_s5 + $0x38] sm:$0xff] }
 0x1a8   :  { %2241 = vmatprep.mubr.msk.bf16.mxu1 %vm454_vm0, %v2411_v29 }
 0x1af   :  { %2242 = vmatmul.mubr.msk.bf16.gmra.mxu1 %vm454_vm0, %v2412_v30 }
 0x1b0   :  { %2245 = vmatprep.mubr.msk.bf16.mxu1 %vm454_vm0, %v2413_v31 }
 0x1b7   :  { %2246 = vmatmul.mubr.msk.bf16.gmra.mxu1 %vm454_vm0, %v2414_v33  ;;  %v98_v33 = vld [vmem:[%s3825_s5 + $0x28] sm:$0xff] }
 0x1b8   :  { %2249 = vmatprep.mubr.msk.bf16.mxu1 %vm454_vm0, %v2415_v34 }
 0x1bf   :  { %2250 = vmatmul.mubr.msk.bf16.gmra.mxu1 %vm454_vm0, %v2416_v36 }
 0x1c0   :  { %2253 = vmatprep.mubr.msk.bf16.mxu1 %vm454_vm0, %v2417_v38 }
 0x1c7   :  { %2254 = vmatmul.mubr.msk.bf16.gmra.mxu1 %vm454_vm0, %v2418_v41 }
 0x1c8   :  { %2257 = vmatprep.mubr.msk.bf16.mxu1 %vm454_vm0, %v2419_v43 }
 0x1cf   :  { %2258 = vmatmul.mubr.msk.bf16.gmra.mxu1 %vm454_vm0, %v2420_v45 }
 0x1d0   :  { %2261 = vmatprep.mubr.msk.bf16.mxu1 %vm454_vm0, %v2421_v52 }
 0x1d7   :  { %2262 = vmatmul.mubr.msk.bf16.gmra.mxu1 %vm454_vm0, %v2422_v53 }
 0x1d8   :  { %861 = vmatprep.mubr.bf16.mxu1 %v2425_v58 }
 0x257   :  { %v2231_v62 = vpop.f32.mrf.mxu1 }
 0x258   :  { %v552_v3 = vadd.f32 %v2231_v62, %v95_v61 }
 0x259   :  { %v543_v63 = vpop.f32.mrf.mxu1 }
 0x25a   :  { %v544_v6 = vadd.f32 %v543_v63, %v93_v0  ;;  %v688_v9 = vmax.f32 %v552_v3, 0.0 }
 0x25b   :  { %v2232_v4 = vpop.f32.mrf.mxu1 }
 0x25c   :  { %v555_v7 = vadd.f32 %v2232_v4, %v96_v2  ;;  %v686_v20 = vmax.f32 %v544_v6, 0.0 }
 0x25d   :  { %v546_v8 = vpop.f32.mrf.mxu1 }
 0x25e   :  { %v689_v11 = vmax.f32 %v555_v7, 0.0  ;;  %v547_v12 = vadd.f32 %v546_v8, %v94_v5 }
 0x25f   :  { %v2235_v18 = vpop.f32.mrf.mxu1 }
 0x260   :  { %v2874_v21 = vpack.c.bf16 %v689_v11, %v688_v9  ;;  %v687_v22 = vmax.f32 %v547_v12, 0.0  ;;  %v568_v30 = vadd.f32 %v2235_v18, %v99_v16 }
 0x261   :  { %v559_v26 = vpop.f32.mrf.mxu1 }
 0x262   :  { %v2882_v29 = vpack.c.bf16 %v687_v22, %v686_v20  ;;  %v560_v34 = vadd.f32 %v559_v26, %v97_v27  ;;  %v692_v41 = vmax.f32 %v568_v30, 0.0  ;;  %v108_v30 = vld [vmem:[%s3825_s5 + $0x78] sm:$0xff] }
 0x263   :  { %v2236_v31 = vpop.f32.mrf.mxu1 }
 0x264   :  { %v571_v36 = vadd.f32 %v2236_v31, %v100_v28  ;;  %v690_v53 = vmax.f32 %v560_v34, 0.0  ;;  %v123_v31 = vld [vmem:[%s3825_s5 + $0xf0] sm:$0xff] }
 0x265   :  { %v562_v38 = vpop.f32.mrf.mxu1  ;;  %v107_v34 = vld [vmem:[%s3825_s5 + $0x70] sm:$0xff] }
 0x266   :  { %v693_v43 = vmax.f32 %v571_v36, 0.0  ;;  %v563_v45 = vadd.f32 %v562_v38, %v98_v33 }
 0x267   :  { %v2887_v52 = vpop.f32.mrf.mxu1 }
 0x268   :  { %v2889_v58 = vpack.c.bf16 %v693_v43, %v692_v41  ;;  %v691_v61 = vmax.f32 %v563_v45, 0.0  ;;  %v121_v41 = vld [vmem:[%s3825_s5 + $0xe0] sm:$0xff]  ;;  %v124_v43 = vld [vmem:[%s3825_s5 + $0xf8] sm:$0xff]  ;;  %v106_v45 = vld [vmem:[%s3825_s5 + $0x68] sm:$0xff] }
 0x269   :  { %v2891_v62 = vpop.f32.mrf.mxu1 }
 0x26a   :  { %v2893_v63 = vpack.c.bf16 %v691_v61, %v690_v53 }
 0x26b   :  { %v2240_v0 = vpop.f32.mrf.mxu1 }
 0x26d   :  { %v2895_v2 = vpop.f32.mrf.mxu1 }
 0x26f   :  { %v2243_v3 = vpop.f32.mrf.mxu1 }
 0x270   :  { %v600_v61 = vadd.f32 %v2243_v3, %v107_v34  ;;  %v119_v3 = vld [vmem:[%s3825_s5 + $0xd0] sm:$0xff] }
 0x271   :  { %v591_v4 = vpop.f32.mrf.mxu1 }
 0x272   :  { %v700_v55 = vmax.f32 %v600_v61, 0.0  ;;  %v592_v42 = vadd.f32 %v591_v4, %v105_v54  ;;  %v102_v54 = vld [vmem:[%s3825_s5 + $0x48] sm:$0xff] }
 0x273   :  { %v2244_v5 = vpop.f32.mrf.mxu1 }
 0x274   :  { %v603_v36 = vadd.f32 %v2244_v5, %v108_v30  ;;  %v122_v30 = vld [vmem:[%s3825_s5 + $0xe8] sm:$0xff] }
 0x275   :  { %v594_v6 = vpop.f32.mrf.mxu1 }
 0x276   :  { %v701_v50 = vmax.f32 %v603_v36, 0.0  ;;  %v595_v46 = vadd.f32 %v594_v6, %v106_v45  ;;  %v118_v36 = vld [vmem:[%s3825_s5 + $0xc8] sm:$0xff]  ;;  %v103_v6 = vld [vmem:[%s3825_s5 + $0x50] sm:$0xff] }
 0x277   :  { %v2899_v7 = vpop.f32.mrf.mxu1 }
 0x278   :  { %v729_v40 = vpack.c.bf16 %v701_v50, %v700_v55 }
 0x279   :  { %v2903_v8 = vpop.f32.mrf.mxu1 }
 0x27b   :  { %v2905_v9 = vpop.f32.mrf.mxu1 }
 0x27d   :  { %v2908_v11 = vpop.f32.mrf.mxu1 }
 0x27f   :  { %v2910_v12 = vpop.f32.mrf.mxu1 }
 0x281   :  { %v2913_v16 = vpop.f32.mrf.mxu1 }
 0x283   :  { %v2915_v18 = vpop.f32.mrf.mxu1 }
 0x285   :  { %v2917_v20 = vpop.f32.mrf.mxu1 }
 0x287   :  { %v2255_v22 = vpop.f32.mrf.mxu1 }
 0x289   :  { %v639_v26 = vpop.f32.mrf.mxu1 }
 0x28b   :  { %v2256_v27 = vpop.f32.mrf.mxu1 }
 0x28c   :  { %v651_v34 = vadd.f32 %v2256_v27, %v120_v1  ;;  %v699_v1 = vmax.f32 %v595_v46, 0.0  ;;  %v116_v46 = vld [vmem:[%s3825_s5 + $0xb8] sm:$0xff] }
 0x28d   :  { %v642_v28 = vpop.f32.mrf.mxu1 }
 0x28e   :  { %v713_v4 = vmax.f32 %v651_v34, 0.0  ;;  %v643_v27 = vadd.f32 %v642_v28, %v118_v36 }
 0x28f   :  { %v2259_v33 = vpop.f32.mrf.mxu1 }
 0x290   :  { %v664_v53 = vadd.f32 %v2259_v33, %v123_v31  ;;  %v104_v33 = vld [vmem:[%s3825_s5 + $0x58] sm:$0xff] }
 0x291   :  { %v655_v38 = vpop.f32.mrf.mxu1 }
 0x292   :  { %v656_v57 = vadd.f32 %v655_v38, %v121_v41  ;;  %v716_v48 = vmax.f32 %v664_v53, 0.0  ;;  %v648_v38 = vadd.f32 %v2255_v22, %v119_v3 }
 0x293   :  { %v2260_v5 = vpop.f32.mrf.mxu1 }
 0x294   :  { %v667_v60 = vadd.f32 %v2260_v5, %v124_v43  ;;  %v714_v41 = vmax.f32 %v656_v57, 0.0  ;;  %v587_v5 = vadd.f32 %v2240_v0, %v104_v33  ;;  %v584_v57 = vadd.f32 %v2887_v52, %v103_v6 }
 0x295   :  { %v658_v31 = vpop.f32.mrf.mxu1  ;;  %v712_v50 = vmax.f32 %v648_v38, 0.0  ;;  %v579_v0 = vadd.f32 %v2895_v2, %v102_v54  ;;  %v635_v52 = vadd.f32 %v2915_v18, %v116_v46  ;;  %v113_v18 = vld [vmem:[%s3825_s5 + $0xa0] sm:$0xff]  ;;  %v112_v38 = vld [vmem:[%s3825_s5 + $0x98] sm:$0xff]  ;;  %v2998_v54 = vld [vmem:[%s3825_s5 + $0x88] sm:$0xff] }
 0x296   :  { %v717_v47 = vmax.f32 %v667_v60, 0.0  ;;  %v659_v51 = vadd.f32 %v658_v31, %v122_v30  ;;  %v117_v60 = vld [vmem:[%s3825_s5 + $0xc0] sm:$0xff]  ;;  %v697_v55 = vmax.f32 %v587_v5, 0.0  ;;  %v696_v61 = vmax.f32 %v584_v57, 0.0 }
 0x297   :  { %v735_v28 = vpack.c.bf16 %v713_v4, %v712_v50  ;;  %v695_v33 = vmax.f32 %v579_v0, 0.0  ;;  %v709_v34 = vmax.f32 %v635_v52, 0.0 }
 0x298   :  { %v737_v43 = vpack.c.bf16 %v717_v47, %v716_v48  ;;  %v715_v45 = vmax.f32 %v659_v51, 0.0  ;;  %v698_v47 = vmax.f32 %v592_v42, 0.0  ;;  %v101_v48 = vld [vmem:[%s3825_s5 + $0x40] sm:$0xff]  ;;  %v640_v51 = vadd.f32 %v639_v26, %v117_v60  ;;  %v115_v42 = vld [vmem:[%s3825_s5 + $0xb0] sm:$0xff]  ;;  %v114_v26 = vld [vmem:[%s3825_s5 + $0xa8] sm:$0xff]  ;;  %v2263_v60 = vpop.f32.mrf.mxu1 }
 0x299   :  { %v576_v30 = vadd.f32 %v2891_v62, %v101_v48  ;;  %v632_v2 = vadd.f32 %v2910_v12, %v115_v42  ;;  %v727_v31 = vpack.c.bf16 %v697_v55, %v696_v61  ;;  %v627_v62 = vadd.f32 %v2917_v20, %v114_v26  ;;  %v3030_v42 = vld [vmem:[%s3825_s5 + $0x100] sm:$0xff]  ;;  %v3044_v26 = vld [vmem:[%s3824_s3 + $0x30] ss:$12 sps:$4 sm:$0xff]  }
 0x29a   :  { %v736_v53 = vpack.c.bf16 %v715_v45, %v714_v41  ;;  %2124 = vmatprep.subr.bf16.mxu0 %v737_v43  ;;  %2339 = vmatprep.subr.bf16.mxu1 %v737_v43  ;;  %v728_v22 = vpack.c.bf16 %v699_v1, %v698_v47  ;;  %v710_v3 = vmax.f32 %v640_v51, 0.0  ;;  %v624_v41 = vadd.f32 %v2913_v16, %v113_v18  ;;  %v2992_v45 = vld [vmem:[%s3825_s5 + $0x90] sm:$0xff]  ;;  %v671_v47 = vpop.f32.mrf.mxu1 }
 0x29b   :  { %2125 = vmatpush3.bf16.msra.mxu0 %v729_v40  ;;  %2347 = vmatpush3.bf16.msra.mxu1 %v729_v40  ;;  %v711_v40 = vmax.f32 %v643_v27, 0.0  ;;  %v694_v6 = vmax.f32 %v576_v30, 0.0  ;;  %v708_v12 = vmax.f32 %v632_v2, 0.0  ;;  %v619_v20 = vadd.f32 %v2905_v9, %v112_v38  ;;  %v3005_v9 = vld [vmem:[%s3825_s5 + $0x80] sm:$0xff]  ;;  %v3016_v51 = vld [vmem:[%s3825_s5 + $0x110] sm:$0xff] }
 0x29c   :  { %2126 = vmatprep.subr.bf16.mxu0 %v736_v53  ;;  %2340 = vmatprep.subr.bf16.mxu1 %v736_v53  ;;  %v707_v1 = vmax.f32 %v627_v62, 0.0  ;;  %v616_v16 = vadd.f32 %v2899_v7, %v2992_v45  ;;  %v706_v4 = vmax.f32 %v624_v41, 0.0  ;;  %v611_v53 = vadd.f32 %v2908_v11, %v2998_v54  ;;  %v3021_v11 = vld [vmem:[%s3825_s5 + $0x118] sm:$0xff]  ;;  %v2264_v55 = vpop.f32.mrf.mxu1  ;;  %v3049_v2 = vld [vmem:[%s3824_s3] ss:$12 sps:$4 sm:$0xff]  }
 0x29d   :  { %v734_v36 = vpack.c.bf16 %v711_v40, %v710_v3  ;;  %v726_v43 = vpack.c.bf16 %v695_v33, %v694_v6  ;;  %v733_v5 = vpack.c.bf16 %v709_v34, %v708_v12  ;;  %v705_v27 = vmax.f32 %v619_v20, 0.0  ;;  %v3057_v3 = vld [vmem:[%s3824_s3 + $0x1c] ss:$12 sps:$4 sm:$0xff]   ;;  %v2430_v6 = vld [vmem:[%s3820_s0 + $0xf0] ss:$8 sps:$4 sm:$0xff]  }
 0x29e   :  { %v732_v57 = vpack.c.bf16 %v707_v1, %v706_v4  ;;  %v704_v46 = vmax.f32 %v616_v16, 0.0  ;;  %v608_v7 = vadd.f32 %v2903_v8, %v3005_v9  ;;  %v703_v50 = vmax.f32 %v611_v53, 0.0  ;;  %v674_v52 = vpop.f32.mrf.mxu1  ;;  %v3071_v62 = vld [vmem:[%s3824_s3 + $0x8] ss:$12 sps:$4 sm:$0xff]   ;;  %v2438_v38 = vld [vmem:[%s3820_s0 + $0xe4] ss:$8 sps:$4 sm:$0xff]  }
 0x29f   :  { %2127 = vmatpush3.bf16.msra.mxu0 %v728_v22  ;;  %2348 = vmatpush3.bf16.msra.mxu1 %v728_v22  ;;  %v680_v8 = vadd.f32 %v2263_v60, %v3016_v51  ;;  %v683_v0 = vadd.f32 %v2264_v55, %v3021_v11  ;;  %v672_v40 = vadd.f32 %v671_v47, %v3030_v42  ;;  %v2436_v12 = vld [vmem:[%s3820_s0 + $0xe0] ss:$8 sps:$4 sm:$0xff]   ;;  %v2442_v41 = vld [vmem:[%s3820_s0 + $0xd4] ss:$8 sps:$4 sm:$0xff]   ;;  %v2445_v1 = vld [vmem:[%s3820_s0 + $0xc4] ss:$8 sps:$4 sm:$0xff]  }
 0x2a0   :  { %2128 = vmatprep.subr.bf16.mxu0 %v735_v28  ;;  %2341 = vmatprep.subr.bf16.mxu1 %v735_v28  ;;  %v731_v48 = vpack.c.bf16 %v705_v27, %v704_v46  ;;  %v3035_v28 = vld [vmem:[%s3825_s5 + $0x108] sm:$0xff]  ;;  %v2449_v16 = vld [vmem:[%s3820_s0 + $0xb4] ss:$8 sps:$4 sm:$0xff]   ;;  %v3120_v4 = vld [vmem:[%s3824_s3 + $0x38] ss:$12 sps:$4 sm:$0xff]   ;;  %v2569_v55 = vmov 2  }
 0x2a1   :  { %v721_v61 = vmax.f32 %v683_v0, 0.0  ;;  %v675_v30 = vadd.f32 %v674_v52, %v3035_v28  ;;  %v3099_v20 = vld [vmem:[%s3824_s3 + $0x20] ss:$12 sps:$4 sm:$0xff]   ;;  %v2447_v27 = vld [vmem:[%s3820_s0 + $0xb0] ss:$8 sps:$4 sm:$0xff]  }
 0x2a2   :  { %v2443_v60 = vld [vmem:[%s3820_s0 + $0xc0] ss:$8 sps:$4 sm:$0xff]   ;;  %v2452_v53 = vld [vmem:[%s3820_s0 + $0xa4] ss:$8 sps:$4 sm:$0xff]   ;;  %v2455_v47 = vld [vmem:[%s3820_s0 + $0x94] ss:$8 sps:$4 sm:$0xff]  }
 0x2a3   :  { %2129 = vmatpush3.bf16.msra.mxu0 %v727_v31  ;;  %2349 = vmatpush3.bf16.msra.mxu1 %v727_v31  ;;  %v718_v31 = vmax.f32 %v672_v40, 0.0  ;;  %v719_v18 = vmax.f32 %v675_v30, 0.0  ;;  %v2453_v46 = vld [vmem:[%s3820_s0 + $0x90] ss:$8 sps:$4 sm:$0xff]  }
 0x2a4   :  { %2130 = vmatprep.subr.bf16.mxu0 %v734_v36  ;;  %2342 = vmatprep.subr.bf16.mxu1 %v734_v36  ;;  %v3076_v36 = vld [vmem:[%s3824_s3 + $0x18] ss:$12 sps:$4 sm:$0xff]  }
 0x2a5   :  { %v738_v34 = vpack.c.bf16 %v719_v18, %v718_v31 }
 0x2a7   :  { %2131 = vmatpush3.bf16.msra.mxu0 %v726_v43  ;;  %2350 = vmatpush3.bf16.msra.mxu1 %v726_v43  ;;  %v3904_v43 = vmov 0  }
 0x2a8   :  { %2132 = vmatprep.subr.bf16.mxu0 %v733_v5  ;;  %2343 = vmatprep.subr.bf16.mxu1 %v733_v5  ;;  %v2440_v5 = vld [vmem:[%s3820_s0 + $0xd0] ss:$8 sps:$4 sm:$0xff]  }
 0x2ab   :  { %2133 = vmatpush3.bf16.msra.mxu0 %v2889_v58  ;;  %2351 = vmatpush3.bf16.msra.mxu1 %v2889_v58  ;;  %v702_v58 = vmax.f32 %v608_v7, 0.0  ;;  %v2458_v7 = vld [vmem:[%s3820_s0 + $0x84] ss:$8 sps:$4 sm:$0xff]  }
 0x2ac   :  { %2134 = vmatprep.subr.bf16.mxu0 %v732_v57  ;;  %2344 = vmatprep.subr.bf16.mxu1 %v732_v57  ;;  %v2450_v57 = vld [vmem:[%s3820_s0 + $0xa0] ss:$8 sps:$4 sm:$0xff]  }
 0x2ad   :  { %v730_v22 = vpack.c.bf16 %v703_v50, %v702_v58  ;;  %v2568_v50 = vmov 1  }
 0x2ae   :  { %2365 = vset.pattern.permute.xlu1 %v2568_v50  ;;  %2364 = vset.pattern.permute.xlu0 %v2568_v50 }
 0x2af   :  { %2135 = vmatpush3.bf16.msra.mxu0 %v2893_v63  ;;  %2352 = vmatpush3.bf16.msra.mxu1 %v2893_v63  ;;  %v720_v63 = vmax.f32 %v680_v8, 0.0 }
 0x2b0   :  { %2136 = vmatprep.subr.bf16.mxu0 %v731_v48  ;;  %2345 = vmatprep.subr.bf16.mxu1 %v731_v48  ;;  %v2456_v48 = vld [vmem:[%s3820_s0 + $0x80] ss:$8 sps:$4 sm:$0xff]  }
 0x2b1   :  { %v739_v33 = vpack.c.bf16 %v721_v61, %v720_v63  ;;  %1026 = vperm.xlu1 %2365, %v2661_v14   ;;  %1022 = vperm.xlu0 %2364, %v2644_v10  }
 0x2b3   :  { %2137 = vmatpush3.bf16.msra.mxu0 %v2874_v21  ;;  %2353 = vmatpush3.bf16.msra.mxu1 %v2874_v21  ;;  %v3841_v21 = vmov 0.0  }
 0x2b4   :  { %2138 = vmatprep.subr.bf16.mxu0 %v730_v22  ;;  %2346 = vmatprep.subr.bf16.mxu1 %v730_v22 }
 0x2b5   :  { %2366 = vset.pattern.permute.xlu1 %v2569_v55  ;;  %1014 = vperm.xlu0 %2364, %v2656_v13  }
 0x2b6   :  { %1058 = vperm.xlu1 %2366, %v2644_v10   ;;  %v3168_v10 = vpop.permute.xlu0 %795 }
 0x2b7   :  { %2139 = vmatpush3.bf16.msra.mxu0 %v2882_v29  ;;  %2354 = vmatpush3.bf16.msra.mxu1 %v2882_v29  ;;  %v2432_v29 = vld [vmem:[%s3820_s0 + $0xf4] ss:$8 sps:$4 sm:$0xff]  }
 0x2b8   :  { %2265 = vmatprep.subr.bf16.mxu1 %v3841_v21 }
 0x2b9   :  { %1006 = vperm.xlu0 %2364, %v2675_v17  }
 0x2ba   :  { %862 = vmatmul.mubr.bf16.vlgmr.msra.gmra.mxu1 %v3044_v26  ;;  %846 = vmatmul.mubr.bf16.vlgmr.msra.gmra.mxu0 %v3049_v2 }
 0x2bb   :  { %2266 = vmatpush3.bf16.msra.mxu1 %v739_v33  ;;  %2269 = vmatprep.mubr.msk.bf16.mxu1 %vm2567_vm1, %v3841_v21 }
 0x2bc   :  { %2267 = vmatprep.subr.bf16.mxu1 %v3841_v21  ;;  %853 = vmatprep.mubr.bf16.mxu0 %v3057_v3 }
 0x2bd   :  { %1062 = vperm.xlu1 %2366, %v2661_v14   ;;  %2372 = vset.pattern.permute.xlu0 %v2569_v55  ;;  %v3170_v14 = vpop.permute.xlu1 %793 }
 0x2be   :  { %1046 = vperm.xlu0 %2372, %v2684_v19  }
 0x2bf   :  { %2268 = vmatpush3.bf16.msra.mxu1 %v738_v34 }
 0x2c0   :  { %1315 = vmatprep.subr.bf16.mxu1 %v2432_v29 }
 0x2c1   :  { %2367 = vset.pattern.permute.xlu1 %v2568_v50  ;;  %v3174_v0 = vpop.permute.xlu1 %789 }
 0x2c2   :  { %2270 = vmatmul.mubr.msk.bf16.vlgmr.msra.gmra.mxu1 %vm803_vm2, %v3071_v62  ;;  %854 = vmatmul.mubr.bf16.gmra.mxu0 %v3076_v36 }
 0x2c3   :  { %1316 = vmatpush1.bf16.msra.mxu1 %v2430_v6  ;;  %2273 = vmatprep.mubr.msk.bf16.mxu1 %vm2567_vm1, %v3841_v21 }
 0x2c4   :  { %1317 = vmatprep.subr.bf16.mxu1 %v2438_v38  ;;  %1163 = vmatprep.mubr.bf16.mxu0 %v3904_v43 }
 0x2c5   :  { %1018 = vperm.xlu1 %2367, %v2667_v15   ;;  %2373 = vset.pattern.permute.xlu0 %v3904_v43  ;;  %v3177_v31 = vpop.permute.xlu1 %791 }
 0x2c7   :  { %1318 = vmatpush1.bf16.msra.mxu1 %v2436_v12 }
 0x2c8   :  { %1319 = vmatprep.subr.bf16.mxu1 %v2442_v41 }
 0x2c9   :  { %2368 = vset.pattern.permute.xlu1 %v2569_v55 }
 0x2ca   :  { %2274 = vmatmul.mubr.msk.bf16.gmra.mxu1 %vm803_vm2, %v3099_v20  ;;  %1050 = vperm.xlu1 %2368, %v2656_v13  }
 0x2cb   :  { %1320 = vmatpush1.bf16.msra.mxu1 %v2440_v5  ;;  %2277 = vmatprep.mubr.msk.bf16.mxu1 %vm2567_vm1, %v3841_v21 }
 0x2cc   :  { %1321 = vmatprep.subr.bf16.mxu1 %v2445_v1 }
 0x2ce   :  { %1054 = vperm.xlu1 %2368, %v2667_v15  }
 0x2cf   :  { %1322 = vmatpush1.bf16.msra.mxu1 %v2443_v60 }
 0x2d0   :  { %1323 = vmatprep.subr.bf16.mxu1 %v2449_v16 }
 0x2d2   :  { %2278 = vmatmul.mubr.msk.bf16.gmra.mxu1 %vm803_vm2, %v3120_v4  ;;  %2369 = vset.pattern.permute.xlu1 %v2568_v50 }
 0x2d3   :  { %1324 = vmatpush1.bf16.msra.mxu1 %v2447_v27  ;;  %1347 = vmatprep.mubr.bf16.mxu1 %v3904_v43  ;;  %v3181_v27 = vpop.permute.xlu1 %787 }
 0x2d4   :  { %1325 = vmatprep.subr.bf16.mxu1 %v2452_v53  ;;  %1010 = vperm.xlu1 %2369, %v2684_v19  }
 0x2d7   :  { %1326 = vmatpush1.bf16.msra.mxu1 %v2450_v57 }
 0x2d8   :  { %1327 = vmatprep.subr.bf16.mxu1 %v2455_v47  ;;  %2370 = vset.pattern.permute.xlu1 %v3904_v43 }
 0x2db   :  { %1328 = vmatpush1.bf16.msra.mxu1 %v2453_v46 }
 0x2dc   :  { %1329 = vmatprep.subr.bf16.mxu1 %v2458_v7 }
 0x2df   :  { %1330 = vmatpush1.bf16.msra.mxu1 %v2456_v48 }
 0x2e2   :  { %1348 = vmatmul.mubr.bf16.vlgmr.msra.gmra.mxu1 %v2701_v23 }
 0x2e3   :  { %1357 = vmatprep.mubr.bf16.mxu1 %v3904_v43 }
 0x2ea   :  { %1358 = vmatmul.mubr.bf16.gmra.mxu1 %v2708_v24  ;;  %v3172_v24 = vpop.permute.xlu0 %785 }
 0x2eb   :  { %1367 = vmatprep.mubr.bf16.mxu1 %v3904_v43 }
 0x2f2   :  { %1368 = vmatmul.mubr.bf16.gmra.mxu1 %v2715_v25 }
 0x2f3   :  { %1668 = vmatprep.mubr.bf16.mxu1 %v2856_v59 }
 0x37a   :  { %v2152_v17 = vpop.f32.mrf.mxu1  ;;  %v2140_v23 = vpop.f32.mrf.mxu0 }
 0x37c   :  { %v2153_v25 = vpop.f32.mrf.mxu1  ;;  %v2141_v59 = vpop.f32.mrf.mxu0 }
 0x37d   :  { %v2142_v58 = vadd.f32 %v2141_v59, %v2140_v23  ;;  %v2154_v57 = vadd.f32 %v2153_v25, %v2152_v17 }
 0x37e   :  { %v2155_v8 = vpop.f32.mrf.mxu1  ;;  %v2143_v13 = vpop.f32.mrf.mxu0 }
 0x37f   :  { %v848_v15 = vadd.f32 %v2142_v58, %v3172_v24  ;;  %v864_v59 = vadd.f32 %v2154_v57, %v3170_v14 }
 0x380   :  { %v2156_v19 = vpop.f32.mrf.mxu1  ;;  %v2144_v22 = vpop.f32.mrf.mxu0 }
 0x381   :  { %v2145_v1 = vadd.f32 %v2144_v22, %v2143_v13  ;;  %v2157_v23 = vadd.f32 %v2156_v19, %v2155_v8 }
 0x382   :  { %v904_v52 = vpop.f32.mrf.mxu1  ;;  %v2146_v63 = vpop.f32.mrf.mxu0 }
 0x383   :  { %v905_v40 = vadd.f32 %v904_v52, %v848_v15  ;;  %v851_v7 = vadd.f32 %v2145_v1, %v3181_v27  ;;  %v867_v17 = vadd.f32 %v2157_v23, %v3168_v10 }
 0x384   :  { %v2271_v61 = vpop.f32.mrf.mxu1  ;;  %v2147_v30 = vpop.f32.mrf.mxu0 }
 0x385   :  { %v2017_v33 = vmul.f32 -1.442695, %v905_v40  ;;  %v2148_v18 = vadd.f32 %v2147_v30, %v2146_v63 }
 0x386   :  { %v907_v29 = vpop.f32.mrf.mxu1  ;;  %v2149_v34 = vpop.f32.mrf.mxu0 }
 0x387   :  { %2462 = vpow2.f32 %v2017_v33  ;;  %v856_v6 = vadd.f32 %v2148_v18, %v3174_v0  ;;  %v908_v13 = vadd.f32 %v907_v29, %v851_v7 }
 0x388   :  { %v2272_v38 = vpop.f32.mrf.mxu1  ;;  %v2150_v12 = vpop.f32.mrf.mxu0 }
 0x389   :  { %v2151_v41 = vadd.f32 %v2150_v12, %v2149_v34  ;;  %v2018_v30 = vmul.f32 -1.442695, %v908_v13  ;;  %v3190_v13 = vld [vmem:[%s3822_s6] sm:$0xff] }
 0x38a   :  { %v912_v5 = vpop.f32.mrf.mxu1 }
 0x38b   :  { %v913_v60 = vadd.f32 %v912_v5, %v856_v6  ;;  %v859_v16 = vadd.f32 %v2151_v41, %v3177_v31 }
 0x38c   :  { %v2275_v53 = vpop.f32.mrf.mxu1 }
 0x38d   :  { %v2019_v47 = vmul.f32 -1.442695, %v913_v60 }
 0x38e   :  { %v915_v46 = vpop.f32.mrf.mxu1 }
 0x38f   :  { %2464 = vpow2.f32 %v2019_v47  ;;  %v916_v48 = vadd.f32 %v915_v46, %v859_v16 }
 0x390   :  { %v2276_v50 = vpop.f32.mrf.mxu1 }
 0x391   :  { %v2020_v58 = vmul.f32 -1.442695, %v916_v48 }
 0x392   :  { %v920_v15 = vpop.f32.mrf.mxu1 }
 0x393   :  { %v921_v22 = vadd.f32 %v920_v15, %v864_v59  ;;  %2466 = vpow2.f32 %v2020_v58 }
 0x394   :  { %v2463_v52 = vpop.eup %2462  ;;  %v2279_v63 = vpop.f32.mrf.mxu1 }
 0x395   :  { %v945_v40 = vadd.f32 1.0, %v2463_v52  ;;  %v2021_v61 = vmul.f32 -1.442695, %v921_v22 }
 0x396   :  { %v923_v25 = vpop.f32.mrf.mxu1 }
 0x397   :  { %2468 = vrcp.f32 %v945_v40  ;;  %v924_v33 = vadd.f32 %v923_v25, %v867_v17 }
 0x398   :  { %2470 = vpow2.f32 %v2021_v61  ;;  %v2280_v18 = vpop.f32.mrf.mxu1 }
 0x399   :  { %v2022_v8 = vmul.f32 -1.442695, %v924_v33  ;;  %2472 = vpow2.f32 %v2018_v30 }
 0x39b   :  { %2474 = vpow2.f32 %v2022_v8 }
 0x39c   :  { %v2465_v19 = vpop.eup %2464 }
 0x39d   :  { %v947_v34 = vadd.f32 1.0, %v2465_v19 }
 0x39f   :  { %2476 = vrcp.f32 %v947_v34 }
 0x3a0   :  { %v2467_v29 = vpop.eup %2466 }
 0x3a1   :  { %v948_v41 = vadd.f32 1.0, %v2467_v29 }
 0x3a2   :  { %v1349_v1 = vpop.f32.mrf.mxu1 }
 0x3a4   :  { %v2469_v6 = vpop.eup %2468  ;;  %v1351_v47 = vpop.f32.mrf.mxu1 }
 0x3a5   :  { %v2471_v38 = vpop.eup %2470  ;;  %965 = vperm.xlu1 %2370, %v2469_v6  }
 0x3a6   :  { %v949_v12 = vadd.f32 1.0, %v2471_v38  ;;  %v2473_v5 = vpop.eup %2472  ;;  %v1353_v46 = vpop.f32.mrf.mxu1 }
 0x3a7   :  { %v946_v57 = vadd.f32 1.0, %v2473_v5  ;;  %v3220_v29 = vadd.f32 %v1353_v46, %v2764_v56 }
 0x3a8   :  { %2478 = vrcp.f32 %v949_v12  ;;  %v2475_v60 = vpop.eup %2474  ;;  %v1355_v7 = vpop.f32.mrf.mxu1  ;;  %v3233_v12 = vadd.f32 %v1351_v47, %v2746_v49 }
 0x3a9   :  { %v950_v16 = vadd.f32 1.0, %v2475_v60  ;;  %2480 = vrcp.f32 %v948_v41  ;;  %v3212_v19 = vadd.f32 %v1355_v7, %v2764_v56  ;;  %3911 = vst [vmem:[#allocation19_spill] sm:$0xff] %v3220_v29  ;;  %v3238_v41 = vadd.f32 %v1349_v1, %v2746_v49  ;;  %v3252_v47 = vpop.permute.xlu0 %1022 }
 0x3aa   :  { %v1359_v23 = vpop.f32.mrf.mxu1  ;;  %3914 = vst [vmem:[#allocation22_spill] sm:$0xff] %v3233_v12  ;;  %3921 = vst [vmem:[#allocation29_spill] sm:$0xff] %v3252_v47 }
 0x3ab   :  { %2482 = vrcp.f32 %v950_v16  ;;  %3910 = vst [vmem:[#allocation18_spill] sm:$0xff] %v3212_v19  ;;  %v3228_v38 = vadd.f32 %v1359_v23, %v2720_v35  ;;  %3915 = vst [vmem:[#allocation23_spill] sm:$0xff] %v3238_v41  ;;  %v1378_v5 = vadd.f32 %v3233_v12, %v3238_v41  ;;  %v3933_v12 = vld [vmem:[#allocation4_spill] sm:$0xff] }
 0x3ac   :  { %v2477_v53 = vpop.eup %2476  ;;  %2484 = vrcp.f32 %v946_v57  ;;  %v1361_v58 = vpop.f32.mrf.mxu1 }
 0x3ad   :  { %975 = vperm.xlu1 %2370, %v2477_v53   ;;  %v3223_v6 = vadd.f32 %v1361_v58, %v2720_v35  ;;  %3913 = vst [vmem:[#allocation21_spill] sm:$0xff] %v3228_v38  ;;  %v3242_v35 = vpop.permute.xlu1 %1026  ;;  %v3256_v49 = vpop.permute.xlu0 %1014 }
 0x3ae   :  { %v1363_v22 = vpop.f32.mrf.mxu1  ;;  %3916 = vst [vmem:[#allocation24_spill] sm:$0xff] %v3242_v35  ;;  %3923 = vst [vmem:[#allocation31_spill] sm:$0xff] %v3256_v49 }
 0x3af   :  { %v3206_v18 = vadd.f32 %v1363_v22, %v2735_v44  ;;  %3912 = vst [vmem:[#allocation20_spill] sm:$0xff] %v3223_v6  ;;  %v1384_v56 = vadd.f32 %v3223_v6, %v3228_v38 }
 0x3b0   :  { %v1365_v52 = vpop.f32.mrf.mxu1 }
 0x3b1   :  { %v3201_v30 = vadd.f32 %v1365_v52, %v2735_v44  ;;  %3908 = vst [vmem:[#allocation16_spill] sm:$0xff] %v3206_v18  ;;  %v3244_v60 = vpop.permute.xlu1 %1058  ;;  %v3260_v7 = vpop.permute.xlu0 %1006  ;;  %v3928_v52 = vld [vmem:[#allocation3_spill] sm:$0xff] }
 0x3b2   :  { %v1369_v63 = vpop.f32.mrf.mxu1  ;;  %3917 = vst [vmem:[#allocation25_spill] sm:$0xff] %v3244_v60  ;;  %3925 = vst [vmem:[#allocation33_spill] sm:$0xff] %v3260_v7 }
 0x3b3   :  { %3907 = vst [vmem:[#allocation15_spill] sm:$0xff] %v3201_v30  ;;  %v3215_v34 = vadd.f32 %v1369_v63, %v2718_v32 }
 0x3b4   :  { %v1371_v40 = vpop.f32.mrf.mxu1 }
 0x3b5   :  { %v2479_v48 = vpop.eup %2478  ;;  %v3209_v8 = vadd.f32 %v1371_v40, %v2718_v32  ;;  %v1381_v32 = vadd.f32 %v3212_v19, %v3220_v29  ;;  %v3246_v16 = vpop.permute.xlu1 %1062  ;;  %v3932_v19 = vld [vmem:[#allocation6_spill] sm:$0xff] }
 0x3b6   :  { %985 = vperm.xlu0 %2373, %v2479_v48   ;;  %v2481_v50 = vpop.eup %2480  ;;  %v1373_v61 = vpop.f32.mrf.mxu1  ;;  %3918 = vst [vmem:[#allocation26_spill] sm:$0xff] %v3246_v16 }
 0x3b7   :  { %3909 = vst [vmem:[#allocation17_spill] sm:$0xff] %v3209_v8  ;;  %v1390_v44 = vadd.f32 %v3209_v8, %v3215_v34  ;;  %v3262_v48 = vpop.permute.xlu0 %1046 }
 0x3b8   :  { %v2483_v59 = vpop.eup %2482  ;;  %v1375_v17 = vpop.f32.mrf.mxu1  ;;  %3926 = vst [vmem:[#allocation34_spill] sm:$0xff] %v3262_v48 }
 0x3b9   :  { %990 = vperm.xlu1 %2370, %v2483_v59   ;;  %v2485_v15 = vpop.eup %2484  ;;  %v3195_v25 = vadd.f32 %v1375_v17, %v2722_v37  ;;  %v3248_v53 = vpop.permute.xlu1 %1018 }
 0x3ba   :  { %980 = vperm.xlu0 %2373, %v2481_v50   ;;  %3919 = vst [vmem:[#allocation27_spill] sm:$0xff] %v3248_v53 }
 0x3bb   :  { %3905 = vst [vmem:[#allocation13_spill] sm:$0xff] %v3195_v25 }
 0x3bd   :  { %2371 = vset.pattern.permute.xlu1 %v2569_v55  ;;  %v3198_v55 = vadd.f32 %v1373_v61, %v2722_v37  ;;  %v1387_v37 = vadd.f32 %v3201_v30, %v3206_v18  ;;  %v3250_v57 = vpop.permute.xlu1 %1050  ;;  %v2539_v18 = vld [vmem:[%s3825_s5 + $0x70] sm:$0xff] }
 0x3be   :  { %970 = vperm.xlu0 %2373, %v2485_v15   ;;  %1042 = vperm.xlu1 %2371, %v3190_v13   ;;  %3920 = vst [vmem:[#allocation28_spill] sm:$0xff] %v3250_v57  ;;  %v3927_v15 = vld [vmem:[#allocation2_spill] sm:$0xff] }
 0x3bf   :  { %3906 = vst [vmem:[#allocation14_spill] sm:$0xff] %v3198_v55  ;;  %v1393_v33 = vadd.f32 %v3195_v25, %v3198_v55 }
 0x3c1   :  { %v3254_v46 = vpop.permute.xlu1 %1054 }
 0x3c2   :  { %2374 = vset.pattern.permute.xlu1 %v3904_v43  ;;  %3922 = vst [vmem:[#allocation30_spill] sm:$0xff] %v3254_v46 }
 0x3c5   :  { %v3258_v1 = vpop.permute.xlu1 %1010 }
 0x3c6   :  { %3924 = vst [vmem:[#allocation32_spill] sm:$0xff] %v3258_v1 }
 0x3dd   :  { %1394 = vadd.xlane.f32.xlu0 %v1393_v33  ;;  %v3929_v33 = vld [vmem:[#allocation10_spill] sm:$0xff] }
 0x3e1   :  { %1388 = vadd.xlane.f32.xlu0 %v1387_v37 }
 0x3e2   :  { %1391 = vadd.xlane.f32.xlu1 %v1390_v44  ;;  %v3930_v44 = vld [vmem:[#allocation8_spill] sm:$0xff] }
 0x3e5   :  { %1382 = vadd.xlane.f32.xlu0 %v1381_v32 }
 0x3e6   :  { %1385 = vadd.xlane.f32.xlu1 %v1384_v56 }
 0x3ea   :  { %1379 = vadd.xlane.f32.xlu1 %v1378_v5  ;;  %v3931_v5 = vld [vmem:[#allocation5_spill] sm:$0xff] }
 0x420   :  { %v966_v50 = vpop.permute.xlu1 %965 }
 0x428   :  { %v976_v23 = vpop.permute.xlu1 %975 }
 0x429   :  { %v998_v63 = vmul.f32 %v976_v23, %v3928_v52 }
 0x42b   :  { %v1034_v41 = vmul.f32 %v3256_v49, %v998_v63 }
 0x431   :  { %v986_v59 = vpop.permute.xlu0 %985 }
 0x432   :  { %v1001_v58 = vmul.f32 %v986_v59, %v2725_v39  ;;  %v1002_v22 = vmul.f32 %v986_v59, %v3927_v15  ;;  %v997_v39 = vmul.f32 %v976_v23, %v3933_v12  ;;  %v3934_v15 = vld [vmem:[#allocation7_spill] sm:$0xff] }
 0x433   :  { %v994_v52 = vmul.f32 %v966_v50, %v3934_v15 }
 0x434   :  { %v991_v61 = vpop.permute.xlu1 %990  ;;  %v1037_v17 = vmul.f32 %v3252_v47, %v1001_v58  ;;  %v1038_v56 = vmul.f32 %v3252_v47, %v1002_v22  ;;  %v1033_v63 = vmul.f32 %v3256_v49, %v997_v39 }
 0x435   :  { %v981_v40 = vpop.permute.xlu0 %980  ;;  %v1003_v21 = vmul.f32 %v991_v61, %v3931_v5  ;;  %v1004_v29 = vmul.f32 %v991_v61, %v3932_v19  ;;  %v3937_v61 = vld [vmem:[#allocation11_spill] sm:$0xff]  ;;  %v3943_v5 = vld [vmem:[#allocation9_spill] sm:$0xff]  ;;  %v1030_v39 = vmul.f32 %v3260_v7, %v994_v52 }
 0x436   :  { %v999_v37 = vmul.f32 %v981_v40, %v3929_v33  ;;  %v1000_v32 = vmul.f32 %v981_v40, %v3930_v44  ;;  %v3280_v40 = vadd.f32 %v3244_v60, %v1037_v17  ;;  %v3936_v44 = vld [vmem:[#allocation12_spill] sm:$0xff]  ;;  %v3286_v23 = vadd.f32 %v3244_v60, %v1038_v56  ;;  %v2540_v60 = vld [vmem:[%s3825_s5 + $0xe0] sm:$0xff] }
 0x437   :  { %v1039_v58 = vmul.f32 %v3242_v35, %v1003_v21  ;;  %v1040_v33 = vmul.f32 %v3242_v35, %v1004_v29 }
 0x438   :  { %v1036_v59 = vmul.f32 %v3248_v53, %v1000_v32  ;;  %3935 = vst [vmem:[#allocation2_spill] sm:$0xff] %v3280_v40  ;;  %v1035_v22 = vmul.f32 %v3248_v53, %v999_v37  ;;  %3938 = vst [vmem:[#allocation3_spill] sm:$0xff] %v3286_v23  ;;  %v3300_v37 = vadd.f32 %v3250_v57, %v1034_v41 }
 0x439   :  { %v971_v30 = vpop.permute.xlu0 %970  ;;  %v3292_v21 = vadd.f32 %v3246_v16, %v1039_v58  ;;  %v3295_v29 = vadd.f32 %v3246_v16, %v1040_v33  ;;  %v3311_v33 = vpop.permute.xlu1 %1042 }
 0x43a   :  { %v995_v19 = vmul.f32 %v971_v30, %v3936_v44  ;;  %v996_v12 = vmul.f32 %v971_v30, %v3937_v61  ;;  %v3289_v32 = vadd.f32 %v3254_v46, %v1036_v59  ;;  %3942 = vst [vmem:[#allocation6_spill] sm:$0xff] %v3300_v37  ;;  %v993_v59 = vmul.f32 %v966_v50, %v3943_v5  ;;  %v3357_v5 = vld [vmem:[%s3826_s4 + $0x10] sm:$0xff]  }
 0x43b   :  { %3940 = vst [vmem:[#allocation8_spill] sm:$0xff] %v3292_v21  ;;  %3941 = vst [vmem:[#allocation5_spill] sm:$0xff] %v3295_v29  ;;  %v1082_v30 = vpack.c.bf16 %v3295_v29, %v3286_v23  ;;  %v1081_v56 = vpack.c.bf16 %v3292_v21, %v3280_v40  ;;  %v3308_v15 = vadd.f32 %v3254_v46, %v1035_v22  ;;  %v2537_v40 = vld [vmem:[%s3825_s5 + $0x78] sm:$0xff] }
 0x43c   :  { %3939 = vst [vmem:[#allocation10_spill] sm:$0xff] %v3289_v32  ;;  %v1032_v17 = vmul.f32 %v3258_v1, %v996_v12  ;;  %v1031_v58 = vmul.f32 %v3258_v1, %v995_v19  ;;  %3945 = vst [vmem:[#allocation7_spill] sm:$0xff] %v3311_v33  ;;  %v1080_v44 = vpack.c.bf16 %v3289_v32, %v3300_v37 }
 0x43d   :  { %3944 = vst [vmem:[#allocation4_spill] sm:$0xff] %v3308_v15  ;;  %1141 = vmatprep.subr.bf16.mxu0 %v1082_v30  ;;  %v3320_v61 = vadd.f32 %v3250_v57, %v1033_v63  ;;  %v3323_v50 = vadd.f32 %v3311_v33, %v1030_v39  ;;  %v1029_v22 = vmul.f32 %v3260_v7, %v993_v59  ;;  %v3341_v30 = vld [vmem:[%s3826_s4] sm:$0xff]   ;;  %3953 = vst [vmem:[#allocation39_spill] sm:$0xff] %v3357_v5 }
 0x43e   :  { %v3315_v41 = vadd.f32 %v3262_v48, %v1032_v17  ;;  %1142 = vmatpush1.bf16.msra.mxu0 %v1081_v56  ;;  %v3327_v19 = vadd.f32 %v3262_v48, %v1031_v58  ;;  %3951 = vst [vmem:[#allocation37_spill] sm:$0xff] %v3341_v30  ;;  %v3349_v56 = vld [vmem:[%s3826_s4 + $0x8] sm:$0xff]   ;;  %v2511_v59 = vld [vmem:[%s3823_s2] sm:$0xff]  }
 0x43f   :  { %3947 = vst [vmem:[#allocation11_spill] sm:$0xff] %v3320_v61  ;;  %3948 = vst [vmem:[#allocation9_spill] sm:$0xff] %v3323_v50  ;;  %1143 = vmatprep.subr.bf16.mxu0 %v1080_v44  ;;  %v1079_v52 = vpack.c.bf16 %v3308_v15, %v3320_v61  ;;  %v3334_v17 = vadd.f32 %v3311_v33, %v1029_v22 }
 0x440   :  { %3946 = vst [vmem:[#allocation12_spill] sm:$0xff] %v3315_v41  ;;  %3949 = vst [vmem:[#allocation35_spill] sm:$0xff] %v3327_v19  ;;  %v1078_v12 = vpack.c.bf16 %v3315_v41, %v3323_v50 }
 0x441   :  { %3950 = vst [vmem:[#allocation36_spill] sm:$0xff] %v3334_v17  ;;  %v1077_v63 = vpack.c.bf16 %v3327_v19, %v3334_v17  ;;  %3952 = vst [vmem:[#allocation38_spill] sm:$0xff] %v3349_v56  ;;  %v2532_v19 = vld [vmem:[%s3825_s5 + $0x8] sm:$0xff] }
 0x442   :  { %1144 = vmatpush1.bf16.msra.mxu0 %v1079_v52 }
 0x443   :  { %1145 = vmatprep.subr.bf16.mxu0 %v1078_v12 }
 0x446   :  { %1146 = vmatpush1.bf16.msra.mxu0 %v1077_v63 }
 0x449   :  { %2026 = vmatmul.mubr.msk.bf16.vlgmr.msra.gmra.mxu0 %vm454_vm0, %v3341_v30 }
 0x44a   :  { %1173 = vmatprep.mubr.bf16.mxu0 %v3904_v43 }
 0x451   :  { %2027 = vmatmul.mubr.msk.bf16.gmra.mxu0 %vm454_vm0, %v3349_v56 }
 0x452   :  { %1183 = vmatprep.mubr.bf16.mxu0 %v3904_v43 }
 0x459   :  { %2028 = vmatmul.mubr.msk.bf16.gmra.mxu0 %vm454_vm0, %v3357_v5 }
 0x45a   :  { %2287 = vmatprep.mubr.msk.bf16.mxu0 %vm454_vm0, %v2511_v59  ;;  %v2512_v59 = vld [vmem:[%s3823_s2 + $0x8] sm:$0xff]  }
 0x466   :  { %v1395_v58 = vpop.xlane.xlu0 %1394 }
 0x467   :  { %v1401_v22 = vmul.f32 0.00390625, %v1395_v58  ;;  %v2513_v58 = vld [vmem:[%s3823_s2 + $0x10] sm:$0xff]  }
 0x46a   :  { %v1389_v39 = vpop.xlane.xlu0 %1388 }
 0x46b   :  { %v1392_v44 = vpop.xlane.xlu1 %1391  ;;  %v1399_v29 = vmul.f32 0.00390625, %v1389_v39  ;;  %v2522_v39 = vld [vmem:[%s3823_s2 + $0x58] sm:$0xff]  }
 0x46c   :  { %v1400_v52 = vmul.f32 0.00390625, %v1392_v44  ;;  %v2523_v44 = vld [vmem:[%s3823_s2 + $0x60] sm:$0xff]  }
 0x46e   :  { %v1404_v12 = vpack.c.bf16 %v1401_v22, %v1400_v52  ;;  %v1383_v56 = vpop.xlane.xlu0 %1382  ;;  %v2524_v22 = vld [vmem:[%s3823_s2 + $0x68] sm:$0xff]   ;;  %v2525_v52 = vld [vmem:[%s3823_s2 + $0x70] sm:$0xff]  }
 0x46f   :  { %v1386_v63 = vpop.xlane.xlu1 %1385  ;;  %v1397_v15 = vmul.f32 0.00390625, %v1383_v56  ;;  %v2520_v56 = vld [vmem:[%s3823_s2 + $0x48] sm:$0xff]  }
 0x470   :  { %v1398_v21 = vmul.f32 0.00390625, %v1386_v63  ;;  %2281 = vmatprep.subr.bf16.mxu0 %v1404_v12  ;;  %v2527_v63 = vld [vmem:[%s3823_s2 + $0x80] sm:$0xff]  }
 0x471   :  { %2282 = vmatpush3.bf16.msra.mxu0 %v1404_v12  ;;  %v2526_v12 = vld [vmem:[%s3823_s2 + $0x78] sm:$0xff]  }
 0x472   :  { %v1403_v32 = vpack.c.bf16 %v1399_v29, %v1398_v21  ;;  %v2514_v21 = vld [vmem:[%s3823_s2 + $0x18] sm:$0xff]   ;;  %v2516_v29 = vld [vmem:[%s3823_s2 + $0x28] sm:$0xff]  }
 0x473   :  { %v1380_v5 = vpop.xlane.xlu1 %1379 }
 0x474   :  { %v1396_v37 = vmul.f32 0.00390625, %v1380_v5  ;;  %2283 = vmatprep.subr.bf16.mxu0 %v1403_v32  ;;  %v2521_v5 = vld [vmem:[%s3823_s2 + $0x50] sm:$0xff]  }
 0x475   :  { %2284 = vmatpush3.bf16.msra.mxu0 %v1403_v32  ;;  %v2515_v32 = vld [vmem:[%s3823_s2 + $0x20] sm:$0xff]  }
 0x476   :  { %v1402_v61 = vpack.c.bf16 %v1397_v15, %v1396_v37  ;;  %v2517_v37 = vld [vmem:[%s3823_s2 + $0x30] sm:$0xff]   ;;  %v2518_v15 = vld [vmem:[%s3823_s2 + $0x38] sm:$0xff]  }
 0x478   :  { %2285 = vmatprep.subr.bf16.mxu0 %v1402_v61 }
 0x479   :  { %2286 = vmatpush3.bf16.msra.mxu0 %v1402_v61  ;;  %v2519_v61 = vld [vmem:[%s3823_s2 + $0x40] sm:$0xff]  }
 0x47c   :  { %2288 = vmatmul.mubr.msk.bf16.vlgmr.msra.gmra.mxu0 %vm454_vm0, %v2512_v59  ;;  %v2528_v59 = vld [vmem:[%s3823_s2 + $0x88] sm:$0xff]  }
 0x47d   :  { %2291 = vmatprep.mubr.msk.bf16.mxu0 %vm454_vm0, %v2513_v58 }
 0x484   :  { %2292 = vmatmul.mubr.msk.bf16.gmra.mxu0 %vm454_vm0, %v2514_v21 }
 0x485   :  { %2295 = vmatprep.mubr.msk.bf16.mxu0 %vm454_vm0, %v2515_v32 }
 0x48c   :  { %2296 = vmatmul.mubr.msk.bf16.gmra.mxu0 %vm454_vm0, %v2516_v29 }
 0x48d   :  { %2299 = vmatprep.mubr.msk.bf16.mxu0 %vm454_vm0, %v2517_v37 }
 0x494   :  { %2300 = vmatmul.mubr.msk.bf16.gmra.mxu0 %vm454_vm0, %v2518_v15 }
 0x495   :  { %2303 = vmatprep.mubr.msk.bf16.mxu0 %vm454_vm0, %v2519_v61 }
 0x49c   :  { %2304 = vmatmul.mubr.msk.bf16.gmra.mxu0 %vm454_vm0, %v2520_v56 }
 0x49d   :  { %2307 = vmatprep.mubr.msk.bf16.mxu0 %vm454_vm0, %v2521_v5 }
 0x4a4   :  { %2308 = vmatmul.mubr.msk.bf16.gmra.mxu0 %vm454_vm0, %v2522_v39 }
 0x4a5   :  { %2311 = vmatprep.mubr.msk.bf16.mxu0 %vm454_vm0, %v2523_v44 }
 0x4ac   :  { %2312 = vmatmul.mubr.msk.bf16.gmra.mxu0 %vm454_vm0, %v2524_v22 }
 0x4ad   :  { %2315 = vmatprep.mubr.msk.bf16.mxu0 %vm454_vm0, %v2525_v52 }
 0x4b4   :  { %2316 = vmatmul.mubr.msk.bf16.gmra.mxu0 %vm454_vm0, %v2526_v12 }
 0x4b5   :  { %2319 = vmatprep.mubr.msk.bf16.mxu0 %vm454_vm0, %v2527_v63  ;;  %v2529_v63 = vld [vmem:[%s3825_s5 + $0x10] sm:$0xff] }
 0x4bc   :  { %2320 = vmatmul.mubr.msk.bf16.gmra.mxu0 %vm454_vm0, %v2528_v59 }
 0x4bd   :  { %1890 = vmatprep.mubr.bf16.mxu0 %v3904_v43 }
 0x509   :  { %v3434_v58 = vpop.f32.mrf.mxu0 }
 0x50a   :  { %3954 = vst [vmem:[#allocation40_spill] sm:$0xff] %v3434_v58 }
 0x50b   :  { %v3436_v21 = vpop.f32.mrf.mxu0 }
 0x50c   :  { %3955 = vst [vmem:[#allocation41_spill] sm:$0xff] %v3436_v21 }
 0x50d   :  { %v3438_v32 = vpop.f32.mrf.mxu0 }
 0x50e   :  { %3956 = vst [vmem:[#allocation42_spill] sm:$0xff] %v3438_v32 }
 0x50f   :  { %v3440_v29 = vpop.f32.mrf.mxu0 }
 0x510   :  { %3957 = vst [vmem:[#allocation43_spill] sm:$0xff] %v3440_v29 }
 0x511   :  { %v3442_v37 = vpop.f32.mrf.mxu0 }
 0x512   :  { %3958 = vst [vmem:[#allocation44_spill] sm:$0xff] %v3442_v37  ;;  %v2531_v37 = vld [vmem:[%s3825_s5 + $0x18] sm:$0xff] }
 0x513   :  { %v3444_v15 = vpop.f32.mrf.mxu0 }
 0x514   :  { %3959 = vst [vmem:[#allocation45_spill] sm:$0xff] %v3444_v15 }
 0x515   :  { %v3446_v61 = vpop.f32.mrf.mxu0 }
 0x516   :  { %3960 = vst [vmem:[#allocation46_spill] sm:$0xff] %v3446_v61 }
 0x517   :  { %v3448_v56 = vpop.f32.mrf.mxu0 }
 0x518   :  { %3961 = vst [vmem:[#allocation47_spill] sm:$0xff] %v3448_v56  ;;  %v2530_v56 = vld [vmem:[%s3825_s5] sm:$0xff] }
 0x519   :  { %v3450_v5 = vpop.f32.mrf.mxu0 }
 0x51a   :  { %3962 = vst [vmem:[#allocation48_spill] sm:$0xff] %v3450_v5 }
 0x51b   :  { %v3452_v39 = vpop.f32.mrf.mxu0 }
 0x51c   :  { %3963 = vst [vmem:[#allocation49_spill] sm:$0xff] %v3452_v39  ;;  %v2538_v39 = vld [vmem:[%s3825_s5 + $0xf0] sm:$0xff] }
 0x51d   :  { %v3454_v44 = vpop.f32.mrf.mxu0 }
 0x51e   :  { %3964 = vst [vmem:[#allocation50_spill] sm:$0xff] %v3454_v44 }
 0x51f   :  { %v3456_v22 = vpop.f32.mrf.mxu0 }
 0x520   :  { %3965 = vst [vmem:[#allocation51_spill] sm:$0xff] %v3456_v22 }
 0x53c   :  { %v2289_v52 = vpop.f32.mrf.mxu0 }
 0x53d   :  { %v1448_v59 = vadd.f32 %v2529_v63, %v2289_v52 }
 0x53e   :  { %v1439_v12 = vpop.f32.mrf.mxu0 }
 0x53f   :  { %v1440_v61 = vadd.f32 %v2530_v56, %v1439_v12  ;;  %v1584_v22 = vmax.f32 %v1448_v59, 0.0 }
 0x540   :  { %v2290_v15 = vpop.f32.mrf.mxu0 }
 0x541   :  { %v1451_v44 = vadd.f32 %v2531_v37, %v2290_v15  ;;  %v1582_v63 = vmax.f32 %v1440_v61, 0.0  ;;  %v2533_v37 = vld [vmem:[%s3825_s5 + $0x30] sm:$0xff]  ;;  %v2536_v61 = vld [vmem:[%s3825_s5 + $0x28] sm:$0xff] }
 0x542   :  { %v1442_v30 = vpop.f32.mrf.mxu0 }
 0x543   :  { %v1585_v41 = vmax.f32 %v1451_v44, 0.0  ;;  %v1443_v29 = vadd.f32 %v2532_v19, %v1442_v30  ;;  %v2534_v44 = vld [vmem:[%s3825_s5 + $0x20] sm:$0xff] }
 0x544   :  { %v2293_v52 = vpop.f32.mrf.mxu0 }
 0x545   :  { %v3470_v32 = vpack.c.bf16 %v1585_v41, %v1584_v22  ;;  %v1583_v50 = vmax.f32 %v1443_v29, 0.0  ;;  %v1464_v15 = vadd.f32 %v2533_v37, %v2293_v52  ;;  %v2535_v41 = vld [vmem:[%s3825_s5 + $0x38] sm:$0xff] }
 0x546   :  { %v1455_v17 = vpop.f32.mrf.mxu0 }
 0x547   :  { %v3472_v56 = vpack.c.bf16 %v1583_v50, %v1582_v63  ;;  %v1456_v59 = vadd.f32 %v2534_v44, %v1455_v17  ;;  %v1588_v29 = vmax.f32 %v1464_v15, 0.0 }
 0x548   :  { %v2294_v12 = vpop.f32.mrf.mxu0 }
 0x549   :  { %v1467_v19 = vadd.f32 %v2535_v41, %v2294_v12  ;;  %v1586_v63 = vmax.f32 %v1456_v59, 0.0 }
 0x54a   :  { %v1458_v30 = vpop.f32.mrf.mxu0 }
 0x54b   :  { %v1589_v50 = vmax.f32 %v1467_v19, 0.0  ;;  %v1459_v22 = vadd.f32 %v2536_v61, %v1458_v30 }
 0x54c   :  { %v3486_v52 = vpop.f32.mrf.mxu0 }
 0x54d   :  { %v3488_v37 = vpack.c.bf16 %v1589_v50, %v1588_v29  ;;  %v1587_v21 = vmax.f32 %v1459_v22, 0.0 }
 0x54e   :  { %v3490_v17 = vpop.f32.mrf.mxu0 }
 0x54f   :  { %v3492_v44 = vpack.c.bf16 %v1587_v21, %v1586_v63 }
 0x550   :  { %v2298_v58 = vpop.f32.mrf.mxu0 }
 0x552   :  { %v3494_v12 = vpop.f32.mrf.mxu0 }
 0x554   :  { %v2301_v15 = vpop.f32.mrf.mxu0 }
 0x555   :  { %v1496_v16 = vadd.f32 %v2539_v18, %v2301_v15  ;;  %v2543_v18 = vld [vmem:[%s3825_s5 + $0xd8] sm:$0xff] }
 0x556   :  { %v1487_v41 = vpop.f32.mrf.mxu0 }
 0x558   :  { %v2302_v19 = vpop.f32.mrf.mxu0 }
 0x559   :  { %v1499_v57 = vadd.f32 %v2537_v40, %v2302_v19  ;;  %v2541_v40 = vld [vmem:[%s3825_s5 + $0xf8] sm:$0xff] }
 0x55a   :  { %v1490_v48 = vpop.f32.mrf.mxu0 }
 0x55b   :  { %v1597_v6 = vmax.f32 %v1499_v57, 0.0  ;;  %v2545_v57 = vld [vmem:[%s3825_s5 + $0x60] sm:$0xff] }
 0x55c   :  { %v3496_v33 = vpop.f32.mrf.mxu0 }
 0x55e   :  { %v3498_v30 = vpop.f32.mrf.mxu0 }
 0x560   :  { %v3500_v61 = vpop.f32.mrf.mxu0 }
 0x562   :  { %v3502_v59 = vpop.f32.mrf.mxu0 }
 0x564   :  { %v3504_v29 = vpop.f32.mrf.mxu0 }
 0x566   :  { %v3506_v50 = vpop.f32.mrf.mxu0 }
 0x568   :  { %v2310_v21 = vpop.f32.mrf.mxu0 }
 0x56a   :  { %v3508_v22 = vpop.f32.mrf.mxu0 }
 0x56c   :  { %v2313_v63 = vpop.f32.mrf.mxu0 }
 0x56e   :  { %v1535_v1 = vpop.f32.mrf.mxu0 }
 0x570   :  { %v2314_v7 = vpop.f32.mrf.mxu0 }
 0x571   :  { %v1547_v15 = vadd.f32 %v2543_v18, %v2314_v7 }
 0x572   :  { %v1538_v46 = vpop.f32.mrf.mxu0 }
 0x574   :  { %v2317_v23 = vpop.f32.mrf.mxu0 }
 0x575   :  { %v1560_v5 = vadd.f32 %v2538_v39, %v2317_v23  ;;  %v2542_v23 = vld [vmem:[%s3825_s5 + $0x68] sm:$0xff] }
 0x576   :  { %v1551_v53 = vpop.f32.mrf.mxu0  ;;  %v1491_v39 = vadd.f32 %v2542_v23, %v1490_v48  ;;  %v2546_v48 = vld [vmem:[%s3825_s5 + $0xd0] sm:$0xff] }
 0x577   :  { %v1552_v35 = vadd.f32 %v2540_v60, %v1551_v53  ;;  %v1612_v25 = vmax.f32 %v1560_v5, 0.0  ;;  %v2544_v60 = vld [vmem:[%s3825_s5 + $0xe8] sm:$0xff]  ;;  %v1544_v23 = vadd.f32 %v2546_v48, %v2313_v63 }
 0x578   :  { %v2318_v49 = vpop.f32.mrf.mxu0 }
 0x579   :  { %v1563_v19 = vadd.f32 %v2541_v40, %v2318_v49  ;;  %v1596_v49 = vmax.f32 %v1496_v16, 0.0  ;;  %v1488_v40 = vadd.f32 %v2545_v57, %v1487_v41  ;;  %v1610_v47 = vmax.f32 %v1552_v35, 0.0  ;;  %v2548_v41 = vld [vmem:[%s3825_s5 + $0xc8] sm:$0xff] }
 0x57a   :  { %v1554_v38 = vpop.f32.mrf.mxu0  ;;  %v1595_v16 = vmax.f32 %v1491_v39, 0.0  ;;  %v1539_v57 = vadd.f32 %v2548_v41, %v1538_v46  ;;  %v1608_v63 = vmax.f32 %v1544_v23, 0.0  ;;  %v2556_v41 = vld [vmem:[%s3825_s5 + $0xa0] sm:$0xff] }
 0x57b   :  { %v1613_v55 = vmax.f32 %v1563_v19, 0.0  ;;  %v1555_v53 = vadd.f32 %v2544_v60, %v1554_v38  ;;  %v2547_v19 = vld [vmem:[%s3825_s5 + $0x58] sm:$0xff]  ;;  %v1625_v38 = vpack.c.bf16 %v1597_v6, %v1596_v49  ;;  %v1609_v60 = vmax.f32 %v1547_v15, 0.0  ;;  %v2550_v6 = vld [vmem:[%s3825_s5 + $0xc0] sm:$0xff] }
 0x57c   :  { %v1483_v18 = vadd.f32 %v2547_v19, %v2298_v58  ;;  %v1594_v35 = vmax.f32 %v1488_v40, 0.0  ;;  %v1536_v58 = vadd.f32 %v2550_v6, %v1535_v1  ;;  %v1607_v40 = vmax.f32 %v1539_v57, 0.0  ;;  %v2321_v57 = vpop.f32.mrf.mxu0 }
 0x57d   :  { %v1633_v7 = vpack.c.bf16 %v1613_v55, %v1612_v25  ;;  %v1611_v5 = vmax.f32 %v1555_v53, 0.0  ;;  %v2549_v25 = vld [vmem:[%s3825_s5 + $0x50] sm:$0xff]  ;;  %v1631_v49 = vpack.c.bf16 %v1609_v60, %v1608_v63  ;;  %v1512_v6 = vadd.f32 %v3496_v33, %v2992_v45 }
 0x57e   :  { %v1480_v55 = vadd.f32 %v2549_v25, %v3486_v52  ;;  %v1593_v39 = vmax.f32 %v1483_v18, 0.0  ;;  %v1624_v15 = vpack.c.bf16 %v1595_v16, %v1594_v35  ;;  %v2552_v52 = vld [vmem:[%s3825_s5 + $0xb8] sm:$0xff]  ;;  %v2555_v18 = vld [vmem:[%s3825_s5 + $0xa8] sm:$0xff]  ;;  %v1576_v45 = vadd.f32 %v2321_v57, %v3016_v51 }
 0x57f   :  { %v1632_v8 = vpack.c.bf16 %v1611_v5, %v1610_v47  ;;  %2184 = vmatprep.subr.bf16.mxu1 %v1633_v7  ;;  %v2551_v47 = vld [vmem:[%s3825_s5 + $0x48] sm:$0xff]  ;;  %v1531_v53 = vadd.f32 %v2552_v52, %v2310_v21  ;;  %v1606_v7 = vmax.f32 %v1536_v58, 0.0 }
 0x580   :  { %2185 = vmatpush3.bf16.msra.mxu1 %v1625_v38  ;;  %v1475_v46 = vadd.f32 %v2551_v47, %v3494_v12  ;;  %v1592_v48 = vmax.f32 %v1480_v55, 0.0  ;;  %v2554_v12 = vld [vmem:[%s3825_s5 + $0xb0] sm:$0xff]  ;;  %v1523_v38 = vadd.f32 %v2555_v18, %v3508_v22  ;;  %v2557_v55 = vld [vmem:[%s3825_s5 + $0x98] sm:$0xff] }
 0x581   :  { %2186 = vmatprep.subr.bf16.mxu1 %v1632_v8  ;;  %v2553_v8 = vld [vmem:[%s3825_s5 + $0x40] sm:$0xff]  ;;  %v1528_v23 = vadd.f32 %v2554_v12, %v3504_v29  ;;  %v1605_v19 = vmax.f32 %v1531_v53, 0.0  ;;  %v1630_v16 = vpack.c.bf16 %v1607_v40, %v1606_v7  ;;  %v1520_v29 = vadd.f32 %v2556_v41, %v3506_v50 }
 0x582   :  { %v1472_v1 = vadd.f32 %v2553_v8, %v3490_v17  ;;  %v1623_v5 = vpack.c.bf16 %v1593_v39, %v1592_v48  ;;  %v1591_v21 = vmax.f32 %v1475_v46, 0.0  ;;  %v1515_v35 = vadd.f32 %v2557_v55, %v3500_v61  ;;  %v1567_v39 = vpop.f32.mrf.mxu0 }
 0x583   :  { %v1604_v60 = vmax.f32 %v1528_v23, 0.0  ;;  %v1603_v63 = vmax.f32 %v1523_v38, 0.0  ;;  %v1602_v58 = vmax.f32 %v1520_v29, 0.0  ;;  %v1507_v50 = vadd.f32 %v3502_v59, %v2998_v54 }
 0x584   :  { %2187 = vmatpush3.bf16.msra.mxu1 %v1624_v15  ;;  %v1590_v17 = vmax.f32 %v1472_v1, 0.0  ;;  %v1601_v47 = vmax.f32 %v1515_v35, 0.0  ;;  %v1600_v15 = vmax.f32 %v1512_v6, 0.0  ;;  %v1504_v61 = vadd.f32 %v3498_v30, %v3005_v9  ;;  %v2322_v52 = vpop.f32.mrf.mxu0 }
 0x585   :  { %2188 = vmatprep.subr.bf16.mxu1 %v1631_v49  ;;  %v1629_v22 = vpack.c.bf16 %v1605_v19, %v1604_v60  ;;  %v1628_v46 = vpack.c.bf16 %v1603_v63, %v1602_v58  ;;  %v1599_v49 = vmax.f32 %v1507_v50, 0.0  ;;  %v1579_v33 = vadd.f32 %v2322_v52, %v3021_v11 }
 0x586   :  { %v1622_v25 = vpack.c.bf16 %v1591_v21, %v1590_v17  ;;  %v1627_v53 = vpack.c.bf16 %v1601_v47, %v1600_v15  ;;  %v1598_v40 = vmax.f32 %v1504_v61, 0.0  ;;  %v1570_v54 = vpop.f32.mrf.mxu0  ;;  %v1568_v48 = vadd.f32 %v1567_v39, %v3030_v42  ;;  %v2558_v42 = vld [vmem:[%s3824_s3 + $0x34] ss:$12 sps:$4 sm:$0xff]  }
 0x587   :  { %v1617_v9 = vmax.f32 %v1579_v33, 0.0  ;;  %v1571_v30 = vadd.f32 %v1570_v54, %v3035_v28  ;;  %v3966_v1 = vmov 0.0  }
 0x588   :  { %2189 = vmatpush3.bf16.msra.mxu1 %v1623_v5  ;;  %v1626_v59 = vpack.c.bf16 %v1599_v49, %v1598_v40 }
 0x589   :  { %2190 = vmatprep.subr.bf16.mxu1 %v1630_v16  ;;  %v1615_v51 = vmax.f32 %v1571_v30, 0.0 }
 0x58c   :  { %2191 = vmatpush3.bf16.msra.mxu1 %v1622_v25 }
 0x58d   :  { %2192 = vmatprep.subr.bf16.mxu1 %v1629_v22 }
 0x590   :  { %2193 = vmatpush3.bf16.msra.mxu1 %v3488_v37  ;;  %v1616_v37 = vmax.f32 %v1576_v45, 0.0 }
 0x591   :  { %2194 = vmatprep.subr.bf16.mxu1 %v1628_v46 }
 0x592   :  { %v1635_v8 = vpack.c.bf16 %v1617_v9, %v1616_v37 }
 0x594   :  { %2195 = vmatpush3.bf16.msra.mxu1 %v3492_v44  ;;  %v1614_v44 = vmax.f32 %v1568_v48, 0.0 }
 0x595   :  { %2196 = vmatprep.subr.bf16.mxu1 %v1627_v53 }
 0x596   :  { %v1634_v11 = vpack.c.bf16 %v1615_v51, %v1614_v44 }
 0x598   :  { %2197 = vmatpush3.bf16.msra.mxu1 %v3470_v32 }
 0x599   :  { %2198 = vmatprep.subr.bf16.mxu1 %v1626_v59 }
 0x59c   :  { %2199 = vmatpush3.bf16.msra.mxu1 %v3472_v56 }
 0x59d   :  { %2323 = vmatprep.subr.bf16.mxu1 %v3966_v1 }
 0x59f   :  { %1669 = vmatmul.mubr.bf16.vlgmr.msra.gmra.mxu1 %v3049_v2 }
 0x5a0   :  { %1676 = vmatprep.mubr.bf16.mxu1 %v3057_v3  ;;  %2324 = vmatpush3.bf16.msra.mxu1 %v1635_v8 }
 0x5a1   :  { %2325 = vmatprep.subr.bf16.mxu1 %v3966_v1 }
 0x5a4   :  { %2326 = vmatpush3.bf16.msra.mxu1 %v1634_v11 }
 0x5a7   :  { %1677 = vmatmul.mubr.bf16.gmra.mxu1 %v3076_v36 }
 0x5a8   :  { %1684 = vmatprep.mubr.bf16.mxu1 %v2558_v42 }
 0x5af   :  { %1685 = vmatmul.mubr.bf16.gmra.mxu1 %v3044_v26 }
 0x5b0   :  { %2327 = vmatprep.mubr.msk.bf16.mxu1 %vm2567_vm1, %v3966_v1 }
 0x5b7   :  { %2328 = vmatmul.mubr.msk.bf16.vlgmr.msra.gmra.mxu1 %vm803_vm2, %v3071_v62 }
 0x5b8   :  { %2331 = vmatprep.mubr.msk.bf16.mxu1 %vm2567_vm1, %v3966_v1 }
 0x5bf   :  { %2332 = vmatmul.mubr.msk.bf16.gmra.mxu1 %vm803_vm2, %v3099_v20 }
 0x5c0   :  { %2335 = vmatprep.mubr.msk.bf16.mxu1 %vm2567_vm1, %v3966_v1 }
 0x5c7   :  { %2336 = vmatmul.mubr.msk.bf16.gmra.mxu1 %vm803_vm2, %v3120_v4 }
 0x65f   :  { %v2200_v28 = vpop.f32.mrf.mxu1 }
 0x661   :  { %v2201_v26 = vpop.f32.mrf.mxu1 }
 0x662   :  { %v2202_v63 = vadd.f32 %v2201_v26, %v2200_v28 }
 0x663   :  { %v2203_v2 = vpop.f32.mrf.mxu1 }
 0x665   :  { %v2204_v3 = vpop.f32.mrf.mxu1 }
 0x666   :  { %v2205_v61 = vadd.f32 %v2204_v3, %v2203_v2  ;;  %v2570_v3 = vmov 3  }
 0x667   :  { %v2206_v36 = vpop.f32.mrf.mxu1 }
 0x668   :  { %v1674_v33 = vadd.f32 %v2205_v61, %v3181_v27  ;;  %v3976_v61 = vld [vmem:[#allocation26_spill] sm:$0xff] }
 0x669   :  { %v2207_v32 = vpop.f32.mrf.mxu1 }
 0x66a   :  { %v2208_v38 = vadd.f32 %v2207_v32, %v2206_v36  ;;  %v2559_v36 = vld [vmem:[%s3822_s6 + $0x20] sm:$0xff] }
 0x66b   :  { %v2209_v56 = vpop.f32.mrf.mxu1 }
 0x66c   :  { %v1679_v41 = vadd.f32 %v2208_v38, %v3174_v0  ;;  %v1671_v0 = vadd.f32 %v2202_v63, %v3172_v24 }
 0x66d   :  { %v2210_v62 = vpop.f32.mrf.mxu1 }
 0x66e   :  { %v2211_v4 = vadd.f32 %v2210_v62, %v2209_v56  ;;  %v2560_v62 = vld [vmem:[%s3822_s6 + $0x8] sm:$0xff] }
 0x66f   :  { %v2212_v12 = vpop.f32.mrf.mxu1 }
 0x670   :  { %v1682_v35 = vadd.f32 %v2211_v4, %v3177_v31  ;;  %v3969_v4 = vld [vmem:[#allocation14_spill] sm:$0xff] }
 0x671   :  { %v2213_v23 = vpop.f32.mrf.mxu1 }
 0x672   :  { %v2214_v60 = vadd.f32 %v2213_v23, %v2212_v12  ;;  %v2561_v12 = vld [vmem:[%s3822_s6 + $0x10] sm:$0xff]  ;;  %v2562_v23 = vld [vmem:[%s3822_s6 + $0x18] sm:$0xff] }
 0x673   :  { %v2215_v7 = vpop.f32.mrf.mxu1 }
 0x674   :  { %v1687_v22 = vadd.f32 %v2214_v60, %v3170_v14 }
 0x675   :  { %v2216_v5 = vpop.f32.mrf.mxu1 }
 0x676   :  { %v2217_v55 = vadd.f32 %v2216_v5, %v2215_v7  ;;  %v2563_v7 = vld [vmem:[%s3822_s6 + $0x28] sm:$0xff] }
 0x677   :  { %v1727_v21 = vpop.f32.mrf.mxu1 }
 0x678   :  { %v1690_v15 = vadd.f32 %v2217_v55, %v3168_v10  ;;  %v1728_v45 = vadd.f32 %v1727_v21, %v1671_v0  ;;  %v3967_v21 = vld [vmem:[#allocation17_spill] sm:$0xff]  ;;  %v3972_v55 = vld [vmem:[#allocation20_spill] sm:$0xff] }
 0x679   :  { %v2329_v20 = vpop.f32.mrf.mxu1 }
 0x67a   :  { %v2082_v40 = vmul.f32 -1.442695, %v1728_v45  ;;  %v3978_v45 = vld [vmem:[#allocation15_spill] sm:$0xff] }
 0x67b   :  { %v1730_v19 = vpop.f32.mrf.mxu1 }
 0x67c   :  { %v1731_v54 = vadd.f32 %v1730_v19, %v1674_v33  ;;  %v3968_v19 = vld [vmem:[#allocation29_spill] sm:$0xff]  ;;  %v3979_v33 = vld [vmem:[#allocation48_spill] sm:$0xff] }
 0x67d   :  { %v2330_v18 = vpop.f32.mrf.mxu1 }
 0x67e   :  { %v2083_v59 = vmul.f32 -1.442695, %v1731_v54  ;;  %v3980_v54 = vld [vmem:[#allocation49_spill] sm:$0xff] }
 0x67f   :  { %v1735_v16 = vpop.f32.mrf.mxu1 }
 0x680   :  { %v1736_v57 = vadd.f32 %v1735_v16, %v1679_v41  ;;  %v3970_v41 = vld [vmem:[#allocation13_spill] sm:$0xff] }
 0x681   :  { %v2333_v17 = vpop.f32.mrf.mxu1 }
 0x682   :  { %v2084_v58 = vmul.f32 -1.442695, %v1736_v57  ;;  %v3971_v57 = vld [vmem:[#allocation21_spill] sm:$0xff] }
 0x683   :  { %v1738_v29 = vpop.f32.mrf.mxu1 }
 0x684   :  { %v1739_v39 = vadd.f32 %v1738_v29, %v1682_v35  ;;  %2486 = vpow2.f32 %v2084_v58 }
 0x685   :  { %v2334_v25 = vpop.f32.mrf.mxu1 }
 0x686   :  { %v2085_v53 = vmul.f32 -1.442695, %v1739_v39 }
 0x687   :  { %v1743_v6 = vpop.f32.mrf.mxu1 }
 0x688   :  { %v1744_v47 = vadd.f32 %v1743_v6, %v1687_v22  ;;  %v3973_v22 = vld [vmem:[#allocation24_spill] sm:$0xff]  ;;  %v3974_v6 = vld [vmem:[#allocation25_spill] sm:$0xff] }
 0x689   :  { %v2337_v50 = vpop.f32.mrf.mxu1 }
 0x68a   :  { %v2086_v46 = vmul.f32 -1.442695, %v1744_v47  ;;  %v3975_v47 = vld [vmem:[#allocation31_spill] sm:$0xff] }
 0x68b   :  { %v1746_v52 = vpop.f32.mrf.mxu1 }
 0x68c   :  { %v1747_v49 = vadd.f32 %v1746_v52, %v1690_v15  ;;  %2488 = vpow2.f32 %v2086_v46 }
 0x68d   :  { %v2338_v31 = vpop.f32.mrf.mxu1  ;;  %2490 = vpow2.f32 %v2085_v53  ;;  %v3977_v53 = vld [vmem:[#allocation16_spill] sm:$0xff] }
 0x68e   :  { %v2087_v14 = vmul.f32 -1.442695, %v1747_v49 }
 0x690   :  { %2492 = vpow2.f32 %v2087_v14 }
 0x691   :  { %2494 = vpow2.f32 %v2082_v40  ;;  %v2487_v10 = vpop.eup %2486 }
 0x692   :  { %2496 = vpow2.f32 %v2083_v59  ;;  %v1770_v48 = vadd.f32 1.0, %v2487_v10  ;;  %v3981_v10 = vld [vmem:[#allocation27_spill] sm:$0xff] }
 0x699   :  { %v2489_v37 = vpop.eup %2488 }
 0x69a   :  { %v1772_v24 = vadd.f32 1.0, %v2489_v37  ;;  %v2491_v9 = vpop.eup %2490 }
 0x69b   :  { %v1771_v8 = vadd.f32 1.0, %v2491_v9 }
 0x69c   :  { %2498 = vrcp.f32 %v1772_v24 }
 0x69d   :  { %v2493_v30 = vpop.eup %2492  ;;  %2500 = vrcp.f32 %v1770_v48 }
 0x69e   :  { %v1773_v44 = vadd.f32 1.0, %v2493_v30  ;;  %v2495_v51 = vpop.eup %2494  ;;  %v3982_v30 = vld [vmem:[#allocation28_spill] sm:$0xff] }
 0x69f   :  { %v1768_v27 = vadd.f32 1.0, %v2495_v51  ;;  %v2497_v1 = vpop.eup %2496  ;;  %v3983_v51 = vld [vmem:[#allocation2_spill] sm:$0xff] }
 0x6a0   :  { %2502 = vrcp.f32 %v1773_v44  ;;  %v1769_v11 = vadd.f32 1.0, %v2497_v1  ;;  %v3984_v1 = vld [vmem:[#allocation3_spill] sm:$0xff] }
 0x6a1   :  { %2504 = vrcp.f32 %v1771_v8 }
 0x6a2   :  { %2506 = vrcp.f32 %v1768_v27 }
 0x6a3   :  { %2508 = vrcp.f32 %v1769_v11 }
 0x6a9   :  { %v2499_v42 = vpop.eup %2498 }
 0x6aa   :  { %1808 = vperm.xlu1 %2374, %v2499_v42   ;;  %v2501_v28 = vpop.eup %2500 }
 0x6ad   :  { %v2503_v26 = vpop.eup %2502 }
 0x6ae   :  { %1813 = vperm.xlu0 %2373, %v2503_v26   ;;  %1798 = vperm.xlu1 %2374, %v2501_v28   ;;  %v2505_v2 = vpop.eup %2504  ;;  %v3985_v28 = vld [vmem:[#allocation30_spill] sm:$0xff] }
 0x6af   :  { %v2507_v32 = vpop.eup %2506 }
 0x6b0   :  { %v2509_v56 = vpop.eup %2508 }
 0x6b2   :  { %2376 = vset.pattern.permute.xlu0 %v2570_v3  ;;  %1803 = vperm.xlu1 %2374, %v2505_v2  }
 0x6b3   :  { %1100 = vperm.xlu0 %2376, %v2559_v36  }
 0x6b6   :  { %1788 = vperm.xlu1 %2374, %v2507_v32   ;;  %v3987_v32 = vld [vmem:[#allocation22_spill] sm:$0xff] }
 0x6b7   :  { %2377 = vset.pattern.permute.xlu0 %v3904_v43 }
 0x6ba   :  { %1793 = vperm.xlu1 %2374, %v2509_v56  }
 0x6be   :  { %2375 = vset.pattern.permute.xlu1 %v2570_v3  ;;  %v3986_v3 = vld [vmem:[#allocation23_spill] sm:$0xff] }
 0x6bf   :  { %1084 = vperm.xlu1 %2375, %v3190_v13  }
 0x6c3   :  { %1088 = vperm.xlu1 %2375, %v2560_v62  }
 0x6c7   :  { %1092 = vperm.xlu1 %2375, %v2561_v12  }
 0x6cb   :  { %1096 = vperm.xlu1 %2375, %v2562_v23  }
 0x6cf   :  { %1104 = vperm.xlu1 %2375, %v2563_v7   ;;  %v3988_v7 = vld [vmem:[#allocation33_spill] sm:$0xff] }
 0x725   :  { %v1809_v13 = vpop.permute.xlu1 %1808 }
 0x726   :  { %v1824_v5 = vmul.f32 %v1809_v13, %v3215_v34  ;;  %v1825_v20 = vmul.f32 %v1809_v13, %v3967_v21  ;;  %v3989_v21 = vld [vmem:[#allocation19_spill] sm:$0xff] }
 0x728   :  { %v1836_v18 = vmul.f32 %v1824_v5, %v3968_v19  ;;  %v1837_v38 = vmul.f32 %v1825_v20, %v3968_v19  ;;  %v3990_v19 = vld [vmem:[#allocation18_spill] sm:$0xff] }
 0x729   :  { %v1814_v16 = vpop.permute.xlu0 %1813  ;;  %v1799_v17 = vpop.permute.xlu1 %1798 }
 0x72a   :  { %v1826_v60 = vmul.f32 %v1814_v16, %v3969_v4  ;;  %v1827_v29 = vmul.f32 %v1814_v16, %v3970_v41  ;;  %v1820_v25 = vmul.f32 %v1799_v17, %v3971_v57  ;;  %v1821_v35 = vmul.f32 %v1799_v17, %v3972_v55  ;;  %v3992_v4 = vld [vmem:[#allocation7_spill] sm:$0xff] }
 0x72b   :  { %v3649_v58 = vadd.f32 %v1836_v18, %v3974_v6  ;;  %v3652_v39 = vadd.f32 %v1837_v38, %v3974_v6  ;;  %v3991_v38 = vld [vmem:[#allocation32_spill] sm:$0xff] }
 0x72c   :  { %v1838_v63 = vmul.f32 %v1826_v60, %v3973_v22  ;;  %v1839_v34 = vmul.f32 %v1827_v29, %v3973_v22  ;;  %v1832_v50 = vmul.f32 %v1820_v25, %v3975_v47  ;;  %v1833_v46 = vmul.f32 %v1821_v35, %v3975_v47  ;;  %v3993_v29 = vld [vmem:[#allocation34_spill] sm:$0xff]  ;;  %v3994_v35 = vld [vmem:[#allocation40_spill] sm:$0xff] }
 0x72d   :  { %v1804_v15 = vpop.permute.xlu1 %1803 }
 0x72e   :  { %v3657_v0 = vadd.f32 %v1838_v63, %v3976_v61  ;;  %v3660_v52 = vadd.f32 %v1839_v34, %v3976_v61  ;;  %v1822_v49 = vmul.f32 %v1804_v15, %v3977_v53  ;;  %v1823_v31 = vmul.f32 %v1804_v15, %v3978_v45  ;;  %v3664_v14 = vpop.permute.xlu0 %1100  ;;  %v3995_v63 = vld [vmem:[#allocation41_spill] sm:$0xff] }
 0x72f   :  { %v1186_v40 = vadd.f32 %v3979_v33, %v3664_v14  ;;  %v1188_v59 = vadd.f32 %v3980_v54, %v3664_v14  ;;  %v3677_v44 = vadd.f32 %v1832_v50, %v3982_v30  ;;  %v3680_v8 = vadd.f32 %v1833_v46, %v3982_v30  ;;  %v3996_v50 = vld [vmem:[#allocation36_spill] sm:$0xff]  ;;  %v3997_v15 = vld [vmem:[#allocation9_spill] sm:$0xff] }
 0x730   :  { %v1834_v37 = vmul.f32 %v1822_v49, %v3981_v10  ;;  %v1835_v24 = vmul.f32 %v1823_v31, %v3981_v10  ;;  %v1857_v48 = vpack.c.bf16 %v3660_v52, %v3652_v39  ;;  %v1856_v9 = vpack.c.bf16 %v3657_v0, %v3649_v58  ;;  %v3998_v49 = vld [vmem:[#allocation42_spill] sm:$0xff]  ;;  %v3999_v31 = vld [vmem:[#allocation43_spill] sm:$0xff]  ;;  %v4004_v30 = vld [vmem:[#allocation45_spill] sm:$0xff] }
 0x731   :  { %v1202_v27 = vmax.f32 %v3983_v51, %v1186_v40  ;;  %v1203_v11 = vmax.f32 %v3984_v1, %v1188_v59  ;;  %v1789_v42 = vpop.permute.xlu1 %1788  ;;  %v4000_v40 = vld [vmem:[#allocation35_spill] sm:$0xff]  ;;  %v4001_v59 = vld [vmem:[#allocation12_spill] sm:$0xff] }
 0x732   :  { %v3685_v26 = vadd.f32 %v1834_v37, %v3985_v28  ;;  %v3688_v2 = vadd.f32 %v1835_v24, %v3985_v28  ;;  %v1816_v36 = vmul.f32 %v1789_v42, %v3986_v3  ;;  %v1817_v56 = vmul.f32 %v1789_v42, %v3987_v32  ;;  %1868 = vmatprep.subr.bf16.mxu0 %v1857_v48  ;;  %v4002_v37 = vld [vmem:[#allocation37_spill] sm:$0xff]  ;;  %v4003_v48 = vld [vmem:[#allocation44_spill] sm:$0xff]  ;;  %v4007_v3 = vld [vmem:[#allocation46_spill] sm:$0xff] }
 0x733   :  { %1214 = vst [vmem:[%s3827_s7 + $0x40] sm:$0xff] %v1202_v27  ;;  %1215 = vst [vmem:[%s3827_s7 + $0x48] sm:$0xff] %v1203_v11  ;;  %1869 = vmatpush1.bf16.msra.mxu0 %v1856_v9  ;;  %v4005_v27 = vld [vmem:[#allocation11_spill] sm:$0xff]  ;;  %v4006_v11 = vld [vmem:[#allocation6_spill] sm:$0xff] }
 0x734   :  { %v1855_v62 = vpack.c.bf16 %v3688_v2, %v3680_v8  ;;  %v1854_v12 = vpack.c.bf16 %v3685_v26, %v3677_v44  ;;  %v1828_v13 = vmul.f32 %v1816_v36, %v3988_v7  ;;  %v1829_v5 = vmul.f32 %v1817_v56, %v3988_v7  ;;  %v4008_v32 = vld [vmem:[#allocation47_spill] sm:$0xff] }
 0x735   :  { %v1794_v23 = vpop.permute.xlu1 %1793 }
 0x736   :  { %v1818_v20 = vmul.f32 %v1794_v23, %v3989_v21  ;;  %v1819_v18 = vmul.f32 %v1794_v23, %v3990_v19  ;;  %1870 = vmatprep.subr.bf16.mxu0 %v1855_v62  ;;  %v1840_v60 = vadd.f32 %v1828_v13, %v3992_v4  ;;  %v1841_v41 = vadd.f32 %v1829_v5, %v3992_v4  ;;  %v4009_v62 = vld [vmem:[#allocation4_spill] sm:$0xff]  ;;  %v4010_v23 = vld [vmem:[#allocation10_spill] sm:$0xff]  ;;  %v4013_v19 = vld [vmem:[#allocation51_spill] sm:$0xff] }
 0x737   :  { %1871 = vmatpush1.bf16.msra.mxu0 %v1854_v12  ;;  %v4011_v13 = vld [vmem:[#allocation38_spill] sm:$0xff] }
 0x738   :  { %v1830_v16 = vmul.f32 %v1818_v20, %v3991_v38  ;;  %v1831_v17 = vmul.f32 %v1819_v18, %v3991_v38  ;;  %v4012_v21 = vld [vmem:[#allocation50_spill] sm:$0xff]  ;;  %v4014_v38 = vld [vmem:[#allocation8_spill] sm:$0xff] }
 0x73a   :  { %v1842_v57 = vadd.f32 %v1830_v16, %v3993_v29  ;;  %v3712_v25 = vadd.f32 %v1831_v17, %v3993_v29  ;;  %v1085_v55 = vpop.permute.xlu1 %1084  ;;  %v4015_v17 = vld [vmem:[#allocation5_spill] sm:$0xff]  ;;  %v4016_v29 = vld [vmem:[#allocation39_spill] sm:$0xff] }
 0x73b   :  { %v1166_v22 = vadd.f32 %v3994_v35, %v1085_v55  ;;  %v1168_v34 = vadd.f32 %v3995_v63, %v1085_v55 }
 0x73c   :  { %v1853_v6 = vpack.c.bf16 %v3712_v25, %v1841_v41  ;;  %v1852_v47 = vpack.c.bf16 %v1842_v57, %v1840_v60 }
 0x73d   :  { %v1194_v46 = vmax.f32 %v3996_v50, %v1166_v22  ;;  %v1195_v61 = vmax.f32 %v3997_v15, %v1168_v34 }
 0x73e   :  { %1872 = vmatprep.subr.bf16.mxu0 %v1853_v6  ;;  %v1089_v53 = vpop.permute.xlu1 %1088 }
 0x73f   :  { %1206 = vst [vmem:[%s3827_s7] sm:$0xff] %v1194_v46  ;;  %1207 = vst [vmem:[%s3827_s7 + $0x8] sm:$0xff] %v1195_v61  ;;  %v1170_v45 = vadd.f32 %v3998_v49, %v1089_v53  ;;  %v1172_v33 = vadd.f32 %v3999_v31, %v1089_v53  ;;  %1873 = vmatpush1.bf16.msra.mxu0 %v1852_v47 }
 0x741   :  { %v1196_v54 = vmax.f32 %v4000_v40, %v1170_v45  ;;  %v1197_v10 = vmax.f32 %v4001_v59, %v1172_v33 }
 0x742   :  { %2088 = vmatmul.mubr.msk.bf16.vlgmr.msra.gmra.mxu0 %vm454_vm0, %v4002_v37  ;;  %v1093_v24 = vpop.permute.xlu1 %1092 }
 0x743   :  { %1208 = vst [vmem:[%s3827_s7 + $0x10] sm:$0xff] %v1196_v54  ;;  %1209 = vst [vmem:[%s3827_s7 + $0x18] sm:$0xff] %v1197_v10  ;;  %v1176_v9 = vadd.f32 %v4003_v48, %v1093_v24  ;;  %v1178_v51 = vadd.f32 %v4004_v30, %v1093_v24  ;;  %1900 = vmatprep.mubr.bf16.mxu0 %v3904_v43 }
 0x745   :  { %v1198_v1 = vmax.f32 %v4005_v27, %v1176_v9  ;;  %v1199_v42 = vmax.f32 %v4006_v11, %v1178_v51 }
 0x746   :  { %v1097_v28 = vpop.permute.xlu1 %1096 }
 0x747   :  { %1210 = vst [vmem:[%s3827_s7 + $0x20] sm:$0xff] %v1198_v1  ;;  %1211 = vst [vmem:[%s3827_s7 + $0x28] sm:$0xff] %v1199_v42  ;;  %v1180_v36 = vadd.f32 %v4007_v3, %v1097_v28  ;;  %v1182_v56 = vadd.f32 %v4008_v32, %v1097_v28 }
 0x749   :  { %v1200_v12 = vmax.f32 %v4009_v62, %v1180_v36  ;;  %v1201_v7 = vmax.f32 %v4010_v23, %v1182_v56 }
 0x74a   :  { %2089 = vmatmul.mubr.msk.bf16.gmra.mxu0 %vm454_vm0, %v4011_v13  ;;  %v1105_v5 = vpop.permute.xlu1 %1104 }
 0x74b   :  { %1212 = vst [vmem:[%s3827_s7 + $0x30] sm:$0xff] %v1200_v12  ;;  %1213 = vst [vmem:[%s3827_s7 + $0x38] sm:$0xff] %v1201_v7  ;;  %v1190_v20 = vadd.f32 %v4012_v21, %v1105_v5  ;;  %v1192_v18 = vadd.f32 %v4013_v19, %v1105_v5  ;;  %1910 = vmatprep.mubr.bf16.mxu0 %v3904_v43 }
 0x74d   :  { %v1204_v16 = vmax.f32 %v4014_v38, %v1190_v20  ;;  %v1205_v4 = vmax.f32 %v4015_v17, %v1192_v18 }
 0x74f   :  { %1216 = vst [vmem:[%s3827_s7 + $0x50] sm:$0xff] %v1204_v16  ;;  %1217 = vst [vmem:[%s3827_s7 + $0x58] sm:$0xff] %v1205_v4 }
 0x752   :  { %2090 = vmatmul.mubr.msk.bf16.gmra.mxu0 %vm454_vm0, %v4016_v29 }
 0x802   :  { %v1892_v35 = vpop.f32.mrf.mxu0 }
 0x803   :  { %v1893_v22 = vadd.f32 %v1892_v35, %v1085_v55 }
 0x804   :  { %v1894_v63 = vpop.f32.mrf.mxu0 }
 0x805   :  { %v1921_v34 = vmax.f32 %v1840_v60, %v1893_v22  ;;  %v1895_v43 = vadd.f32 %v1894_v63, %v1085_v55 }
 0x806   :  { %v1896_v6 = vpop.f32.mrf.mxu0 }
 0x807   :  { %2091 = vst [vmem:[%s3827_s7 + $0x60] sm:$0xff] %v1921_v34  ;;  %v1922_v47 = vmax.f32 %v1841_v41, %v1895_v43  ;;  %v1897_v50 = vadd.f32 %v1896_v6, %v1089_v53 }
 0x808   :  { %v1898_v46 = vpop.f32.mrf.mxu0 }
 0x809   :  { %2092 = vst [vmem:[%s3827_s7 + $0x68] sm:$0xff] %v1922_v47  ;;  %v1923_v15 = vmax.f32 %v1842_v57, %v1897_v50  ;;  %v1899_v61 = vadd.f32 %v1898_v46, %v1089_v53 }
 0x80a   :  { %v1902_v49 = vpop.f32.mrf.mxu0 }
 0x80b   :  { %2093 = vst [vmem:[%s3827_s7 + $0x70] sm:$0xff] %v1923_v15  ;;  %v1924_v60 = vmax.f32 %v3712_v25, %v1899_v61  ;;  %v1903_v55 = vadd.f32 %v1902_v49, %v1093_v24 }
 0x80c   :  { %v1904_v45 = vpop.f32.mrf.mxu0 }
 0x80d   :  { %2094 = vst [vmem:[%s3827_s7 + $0x78] sm:$0xff] %v1924_v60  ;;  %v1925_v41 = vmax.f32 %v3677_v44, %v1903_v55  ;;  %v1905_v31 = vadd.f32 %v1904_v45, %v1093_v24 }
 0x80e   :  { %v1906_v33 = vpop.f32.mrf.mxu0 }
 0x80f   :  { %2095 = vst [vmem:[%s3827_s7 + $0x80] sm:$0xff] %v1925_v41  ;;  %v1926_v57 = vmax.f32 %v3680_v8, %v1905_v31  ;;  %v1907_v53 = vadd.f32 %v1906_v33, %v1097_v28 }
 0x810   :  { %v1908_v40 = vpop.f32.mrf.mxu0 }
 0x811   :  { %2096 = vst [vmem:[%s3827_s7 + $0x88] sm:$0xff] %v1926_v57  ;;  %v1927_v25 = vmax.f32 %v3685_v26, %v1907_v53  ;;  %v1909_v54 = vadd.f32 %v1908_v40, %v1097_v28 }
 0x812   :  { %v1912_v59 = vpop.f32.mrf.mxu0 }
 0x813   :  { %2097 = vst [vmem:[%s3827_s7 + $0x90] sm:$0xff] %v1927_v25  ;;  %v1928_v44 = vmax.f32 %v3688_v2, %v1909_v54  ;;  %v1913_v10 = vadd.f32 %v1912_v59, %v3664_v14 }
 0x814   :  { %v1914_v37 = vpop.f32.mrf.mxu0 }
 0x815   :  { %2098 = vst [vmem:[%s3827_s7 + $0x98] sm:$0xff] %v1928_v44  ;;  %v1929_v8 = vmax.f32 %v3649_v58, %v1913_v10  ;;  %v1915_v24 = vadd.f32 %v1914_v37, %v3664_v14 }
 0x816   :  { %v1916_v26 = vpop.f32.mrf.mxu0 }
 0x817   :  { %2099 = vst [vmem:[%s3827_s7 + $0xa0] sm:$0xff] %v1929_v8  ;;  %v1930_v48 = vmax.f32 %v3652_v39, %v1915_v24  ;;  %v1917_v9 = vadd.f32 %v1916_v26, %v1105_v5 }
 0x818   :  { %v1918_v2 = vpop.f32.mrf.mxu0 }
 0x819   :  { %2100 = vst [vmem:[%s3827_s7 + $0xa8] sm:$0xff] %v1930_v48  ;;  %v1931_v30 = vmax.f32 %v3657_v0, %v1917_v9  ;;  %v1919_v51 = vadd.f32 %v1918_v2, %v1105_v5 }
 0x81b   :  { %2101 = vst [vmem:[%s3827_s7 + $0xb0] sm:$0xff] %v1931_v30  ;;  %v1932_v58 = vmax.f32 %v3660_v52, %v1919_v51 }
 0x81d   :  { %2102 = vst [vmem:[%s3827_s7 + $0xb8] sm:$0xff] %v1932_v58 }

</bundles_post_ra>
